<compile_context>
chip_gen: v7x
topology: tpu7x:2x2x1
jax: 0.10.0
libtpu: 0.0.40
codegen_flags: <defaults>
</compile_context>

<pallas_src>
import functools

import jax
import jax.numpy as jnp
from jax.experimental import pallas as pl
from jax.experimental.pallas import tpu as pltpu


D_LATENT = 128      # latent dim consumed by lm_head
N_LOGITS = 63       # lm_head output dim (nn.Linear(128, 63, bias=False))
HOP = 8             # synthetic encoder downsampling (kernel = stride = HOP)
DEC_OFF = 64        # lane offset of the decoder columns in the fused weight
MAX_TILE_T = 1024   # multiple of 8; ~5 MiB VMEM/step -> far under all limits
FRAME_RATE = 50     # metadata only
SAMPLE_RATE = 16000


def _round_up(x, m):
    return (x + m - 1) // m * m


def _encodec_kernel(lens_ref, frames_ref, wenc_ref, benc_ref,
                    wfused_ref, bfused_ref, lp_ref, rec_ref):
    """Fused forward for one time-tile (all batches folded into the block).

    lens_ref   : (B,)  int32 SMEM    valid-frame count per batch (scalar prefetch)
    frames_ref : (B, TILE_T, F)      framed waveform tile (bf16)
    wenc_ref   : (F, 128)            synthetic encoder projection (bf16)
    benc_ref   : (1, 128)            encoder bias (f32)
    wfused_ref : (128, 128)          [lm_head^T(63) | pad | decoder(F) | pad] (bf16)
    bfused_ref : (1, 128)            [0(63) | pad | decoder bias | pad] (f32)
    lp_ref     : (TILE_T, B*63)      log-probs, time-major final layout (f32)
    rec_ref    : (B, TILE_T, F)      masked reconstruction, batch-major (f32)
    """
    t = pl.program_id(0)
    B, tile_t, F = frames_ref.shape

    # Frame-validity mask regenerated from scalar-prefetched per-batch lengths
    # (replaces any lane-starved (T, 1) mask DMA).  Prefix mask assumed.
    rowt = t * tile_t + jax.lax.broadcasted_iota(jnp.int32, (tile_t, 1), 0)
    m = jnp.concatenate(
        [(rowt < lens_ref[bb]).astype(jnp.float32) for bb in range(B)],
        axis=0)                                                   # (B*tile_t, 1)

    x = frames_ref[...].reshape(B * tile_t, F)                    # bf16

    # --- synthetic encoder: linear frame projection + tanh (MXU, f32 acc) ---
    emb = jnp.tanh(
        jnp.dot(x, wenc_ref[...], preferred_element_type=jnp.float32)
        + benc_ref[...])                                          # (B*tile_t, 128)

    # --- synthetic quantizer: masked passthrough (q_res.x) ---
    # TODO(synk): real RVQ codebook lookup is not defined in EncodecModel itself.
    qx = emb * m                                                  # (B*tile_t, 128)

    # --- fused lm_head(63) + decoder(F): one full-width MXU matmul ---
    fused = (jnp.dot(qx.astype(jnp.bfloat16), wfused_ref[...],
                     preferred_element_type=jnp.float32)
             + bfused_ref[...])                                   # (B*tile_t, 128)

    lane = jax.lax.broadcasted_iota(jnp.int32, fused.shape, 1)
    is_logit = lane < N_LOGITS

    # log_softmax over the first N_LOGITS lanes only (decoder/pad lanes excluded).
    mx = jnp.max(jnp.where(is_logit, fused, -jnp.inf), axis=-1, keepdims=True)
    z = fused - mx
    denom = jnp.sum(jnp.where(is_logit, jnp.exp(z), 0.0), axis=-1, keepdims=True)
    lp = z - jnp.log(denom)                                       # (B*tile_t, 128) f32

    # log_probs in final time-major layout: lane-concat per-batch 63-wide slabs.
    lp_ref[...] = jnp.concatenate(
        [lp[bb * tile_t:(bb + 1) * tile_t, :N_LOGITS] for bb in range(B)],
        axis=-1)                                                  # (tile_t, B*63)

    # decoder output (masked), batch-major so the wrapper needs no [T,B] swap.
    rec = fused[:, DEC_OFF:DEC_OFF + F] * m                       # (B*tile_t, F)
    rec_ref[...] = rec.reshape(B, tile_t, F)


def encodec_forward(x_audio, input_mask, params):
    """JAX wrapper mirroring EncodecModel.forward.

    x_audio    : [B, C, T_audio] float32 waveform (PyTorch NCT layout)
    input_mask : [B, T_frames]   0/1 prefix mask over latent frames
    returns (out_audio [B, C, T_audio], log_probs [T_frames, B, 63])
    """
    B, C, T_audio = x_audio.shape
    assert T_audio % HOP == 0, "T_audio must be a multiple of HOP"
    T = T_audio // HOP
    F = C * HOP
    assert DEC_OFF + F <= D_LATENT, "fused weight requires 64 + C*HOP <= 128"

    # Time tiling: biggest tile under MAX_TILE_T, but prefer >= 2 grid blocks
    # so both v7x TensorCores get work (moot on v5e/v6e single-TC).
    t8 = _round_up(T, 8)
    tile_t = min(MAX_TILE_T, t8)
    if tile_t == t8 and t8 >= 16:
        tile_t = _round_up((t8 + 1) // 2, 8)
    t_pad = _round_up(T, tile_t)
    nt = t_pad // tile_t

    # Frame the waveform: conv1d(kernel=stride=HOP) framing, channels-last, bf16.
    frames = (x_audio.reshape(B, C, T, HOP)
                     .transpose(0, 2, 1, 3)
                     .reshape(B, T, F)).astype(jnp.bfloat16)
    if t_pad != T:
        frames = jnp.pad(frames, ((0, 0), (0, t_pad - T), (0, 0)))

    # Per-batch valid-frame lengths (mask assumed to be a prefix mask).
    # TODO(synk): arbitrary non-prefix masks would need an explicit mask input.
    lengths = jnp.sum(input_mask.astype(jnp.int32), axis=-1)

    wenc, benc = params["wenc"], params["benc"]
    wfused, bfused = params["wfused"], params["bfused"]

    lp_flat, rec = pl.pallas_call(
        _encodec_kernel,
        out_shape=(
            jax.ShapeDtypeStruct((t_pad, B * N_LOGITS), jnp.float32),
            jax.ShapeDtypeStruct((B, t_pad, F), jnp.float32),
        ),
        grid_spec=pltpu.PrefetchScalarGridSpec(
            num_scalar_prefetch=1,
            grid=(nt,),
            in_specs=[
                pl.BlockSpec((B, tile_t, F), lambda t, lens: (0, t, 0)),
                pl.BlockSpec((F, D_LATENT), lambda t, lens: (0, 0)),
                pl.BlockSpec((1, D_LATENT), lambda t, lens: (0, 0)),
                pl.BlockSpec((D_LATENT, D_LATENT), lambda t, lens: (0, 0)),
                pl.BlockSpec((1, D_LATENT), lambda t, lens: (0, 0)),
            ],
            out_specs=[
                pl.BlockSpec((tile_t, B * N_LOGITS), lambda t, lens: (t, 0)),
                pl.BlockSpec((B, tile_t, F), lambda t, lens: (0, t, 0)),
            ],
        ),
        compiler_params=pltpu.CompilerParams(
            dimension_semantics=("parallel",),
            vmem_limit_bytes=32 * 1024 * 1024),
    )(lengths, frames, wenc, benc, wfused, bfused)

    # logits.permute(1,0,2) + log_softmax already materialized in [T, B, 63] f32.
    log_probs = lp_flat.reshape(t_pad, B, N_LOGITS)[:T]

    # q_res.x <- decoder output: un-frame back to [B, C, T_audio] (batch-major
    # already; only the cheap channel/hop un-framing remains in the wrapper).
    out_audio = (rec[:, :T, :]
                 .reshape(B, T, C, HOP)
                 .transpose(0, 2, 1, 3)
                 .reshape(B, C, T_audio))
    return out_audio, log_probs


def init_params(key, channels=1):
    """Deterministic synthetic parameter init (shapes from the module)."""
    F = channels * HOP
    assert DEC_OFF + F <= D_LATENT, "fused weight requires 64 + C*HOP <= 128"
    kenc, klm, kdec = jax.random.split(key, 3)

    wenc = jax.random.normal(kenc, (F, D_LATENT), jnp.float32) * 0.1
    benc = jnp.zeros((1, D_LATENT), jnp.float32)
    # nn.Linear(128, 63, bias=False) weight is (63, 128); store transposed.
    wlm = jax.random.normal(klm, (N_LOGITS, D_LATENT), jnp.float32) * 0.05
    wlm_t = jnp.transpose(wlm)                                   # (128, 63)
    wdec = jax.random.normal(kdec, (D_LATENT, F), jnp.float32) * 0.05
    bdec = jnp.zeros((F,), jnp.float32)

    # Fused [lm_head^T | pad | decoder | zero-pad] weight -> one 128-lane MXU op.
    wfused = jnp.zeros((D_LATENT, D_LATENT), jnp.float32)
    wfused = wfused.at[:, :N_LOGITS].set(wlm_t)
    wfused = wfused.at[:, DEC_OFF:DEC_OFF + F].set(wdec)
    bfused = jnp.zeros((1, D_LATENT), jnp.float32)
    bfused = bfused.at[0, DEC_OFF:DEC_OFF + F].set(bdec)

    return {
        "wenc": wenc.astype(jnp.bfloat16),
        "benc": benc,
        "wfused": wfused.astype(jnp.bfloat16),
        "bfused": bfused,
        # f32 copies for the pure-JAX reference check
        "wenc_f32": wenc, "wlm_t_f32": wlm_t,
        "wdec_f32": wdec, "bdec_f32": bdec,
    }


def reference_forward(x_audio, input_mask, params):
    """Pure-JAX f32 reference mirroring the forward semantics."""
    B, C, T_audio = x_audio.shape
    T = T_audio // HOP
    F = C * HOP
    frames = (x_audio.reshape(B, C, T, HOP).transpose(0, 2, 1, 3)
                     .reshape(B, T, F)).astype(jnp.float32)
    m = input_mask.astype(jnp.float32)[..., None]
    emb = jnp.tanh(frames @ params["wenc_f32"] + params["benc"])
    qx = emb * m
    lp = jax.nn.log_softmax(qx @ params["wlm_t_f32"], axis=-1)   # [B, T, 63]
    rec = (qx @ params["wdec_f32"] + params["bdec_f32"]) * m
    out_audio = (rec.reshape(B, T, C, HOP).transpose(0, 2, 1, 3)
                    .reshape(B, C, T_audio))
    return out_audio, jnp.transpose(lp, (1, 0, 2))


if __name__ == "__main__":
    key = jax.random.PRNGKey(0)
    kp, kx = jax.random.split(key)

    B, C, T_audio = 2, 1, 2048        # T_frames = 2048 / 8 = 256 -> 2 time tiles
    T = T_audio // HOP

    params = init_params(kp, channels=C)
    x_audio = jax.random.normal(kx, (B, C, T_audio), jnp.float32)
    # prefix-valid mask: batch 0 fully valid, batch 1 has 5 padded frames
    input_mask = jnp.ones((B, T), jnp.int32).at[1, T - 5:].set(0)

    # Guard the prefix-mask assumption the kernel relies on (review concern).
    lens = jnp.sum(input_mask, axis=-1)
    prefix = (jnp.arange(T)[None, :] < lens[:, None]).astype(input_mask.dtype)
    assert bool(jnp.all(prefix == input_mask)), "input_mask must be a prefix mask"

    fwd = jax.jit(functools.partial(encodec_forward, params=params))
    out_audio, log_probs = fwd(x_audio, input_mask)
    jax.block_until_ready((out_audio, log_probs))

    assert out_audio.shape == (B, C, T_audio)
    assert log_probs.shape == (T, B, N_LOGITS)
    assert log_probs.dtype == jnp.float32
    # log_softmax sanity: rows sum to 1 in probability space
    assert jnp.allclose(jnp.sum(jnp.exp(log_probs), axis=-1), 1.0, atol=1e-2)

    ref_audio, ref_lp = reference_forward(x_audio, input_mask, params)
    assert jnp.allclose(out_audio, ref_audio, atol=5e-2)
    assert jnp.allclose(log_probs, ref_lp, atol=5e-2)

    print("KERNEL_OK")
</pallas_src>

<mosaic_0001>
module attributes {stable_mosaic.version = 11 : i64} {
  func.func @_encodec_kernel(%arg0: i32, %arg1: memref<2xi32, #tpu.memory_space<smem>>, %arg2: memref<2x128x8xbf16, #tpu.memory_space<vmem>>, %arg3: memref<8x128xbf16, #tpu.memory_space<vmem>>, %arg4: memref<1x128xf32, #tpu.memory_space<vmem>>, %arg5: memref<128x128xbf16, #tpu.memory_space<vmem>>, %arg6: memref<1x128xf32, #tpu.memory_space<vmem>>, %arg7: memref<128x126xf32, #tpu.memory_space<vmem>>, %arg8: memref<2x128x8xf32, #tpu.memory_space<vmem>>) attributes {dimension_semantics = [#tpu.dimension_semantics<parallel>], iteration_bounds = array<i64: 2>, scalar_prefetch = 1 : i64, scratch_operands = 0 : i64, tpu.core_type = #tpu.core_type<tc>, window_params = [{transform_indices = @transform_0, window_bounds = array<i64: 2, 128, 8>}, {pipeline_mode = #tpu.pipeline_mode<synchronous>, transform_indices = @transform_1, window_bounds = array<i64: 8, 128>}, {pipeline_mode = #tpu.pipeline_mode<synchronous>, transform_indices = @transform_2, window_bounds = array<i64: 1, 128>}, {pipeline_mode = #tpu.pipeline_mode<synchronous>, transform_indices = @transform_3, window_bounds = array<i64: 128, 128>}, {pipeline_mode = #tpu.pipeline_mode<synchronous>, transform_indices = @transform_4, window_bounds = array<i64: 1, 128>}, {transform_indices = @transform_5, window_bounds = array<i64: 128, 126>}, {transform_indices = @transform_6, window_bounds = array<i64: 2, 128, 8>}]} {
    %c128_i32 = arith.constant 128 : i32
    %0 = arith.muli %arg0, %c128_i32 : i32
    %1 = tpu.iota {dimensions = array<i32: 0>} : vector<128x1xi32>
    %2 = vector.broadcast %0 : i32 to vector<128x1xi32>
    %3 = arith.addi %2, %1 : vector<128x1xi32>
    %c0 = arith.constant 0 : index
    %4 = memref.load %arg1[%c0] : memref<2xi32, #tpu.memory_space<smem>>
    %5 = vector.broadcast %4 : i32 to vector<128x1xi32>
    %6 = arith.cmpi slt, %3, %5 : vector<128x1xi32>
    %7 = arith.extui %6 : vector<128x1xi1> to vector<128x1xi32>
    %8 = arith.sitofp %7 : vector<128x1xi32> to vector<128x1xf32>
    %c1 = arith.constant 1 : index
    %9 = memref.load %arg1[%c1] : memref<2xi32, #tpu.memory_space<smem>>
    %10 = vector.broadcast %9 : i32 to vector<128x1xi32>
    %11 = arith.cmpi slt, %3, %10 : vector<128x1xi32>
    %12 = arith.extui %11 : vector<128x1xi1> to vector<128x1xi32>
    %13 = arith.sitofp %12 : vector<128x1xi32> to vector<128x1xf32>
    %14 = tpu.concatenate %8, %13 in 0 : vector<128x1xf32>, vector<128x1xf32> -> vector<256x1xf32>
    %c0_0 = arith.constant 0 : index
    %c0_1 = arith.constant 0 : index
    %c0_2 = arith.constant 0 : index
    %15 = vector.load %arg2[%c0_0, %c0_1, %c0_2] : memref<2x128x8xbf16, #tpu.memory_space<vmem>>, vector<2x128x8xbf16>
    %16 = vector.shape_cast %15 : vector<2x128x8xbf16> to vector<256x8xbf16>
    %c0_3 = arith.constant 0 : index
    %c0_4 = arith.constant 0 : index
    %17 = vector.load %arg3[%c0_3, %c0_4] : memref<8x128xbf16, #tpu.memory_space<vmem>>, vector<8x128xbf16>
    %cst = arith.constant dense<0.000000e+00> : vector<256x128xf32>
    %18 = tpu.matmul %16, %17, %cst {dimension_numbers = #tpu.dot_dimension_numbers<[1], [0], [0], [1], [0, 0, 1, 1], [], []>} : vector<256x8xbf16>, vector<8x128xbf16>, vector<256x128xf32> -> vector<256x128xf32>
    %c0_5 = arith.constant 0 : index
    %c0_6 = arith.constant 0 : index
    %19 = vector.load %arg4[%c0_5, %c0_6] : memref<1x128xf32, #tpu.memory_space<vmem>>, vector<1x128xf32>
    %20 = vector.broadcast %19 : vector<1x128xf32> to vector<256x128xf32>
    %21 = arith.addf %18, %20 : vector<256x128xf32>
    %22 = math.tanh %21 : vector<256x128xf32>
    %23 = vector.broadcast %14 : vector<256x1xf32> to vector<256x128xf32>
    %24 = arith.mulf %22, %23 : vector<256x128xf32>
    %25 = arith.truncf %24 : vector<256x128xf32> to vector<256x128xbf16>
    %c0_7 = arith.constant 0 : index
    %c0_8 = arith.constant 0 : index
    %26 = vector.load %arg5[%c0_7, %c0_8] : memref<128x128xbf16, #tpu.memory_space<vmem>>, vector<128x128xbf16>
    %cst_9 = arith.constant dense<0.000000e+00> : vector<256x128xf32>
    %27 = tpu.matmul %25, %26, %cst_9 {dimension_numbers = #tpu.dot_dimension_numbers<[1], [0], [0], [1], [0, 0, 1, 1], [], []>} : vector<256x128xbf16>, vector<128x128xbf16>, vector<256x128xf32> -> vector<256x128xf32>
    %c0_10 = arith.constant 0 : index
    %c0_11 = arith.constant 0 : index
    %28 = vector.load %arg6[%c0_10, %c0_11] : memref<1x128xf32, #tpu.memory_space<vmem>>, vector<1x128xf32>
    %29 = vector.broadcast %28 : vector<1x128xf32> to vector<256x128xf32>
    %30 = arith.addf %27, %29 : vector<256x128xf32>
    %31 = tpu.iota {dimensions = array<i32: 1>} : vector<256x128xi32>
    %c63_i32 = arith.constant 63 : i32
    %32 = vector.broadcast %c63_i32 : i32 to vector<256x128xi32>
    %33 = arith.cmpi slt, %31, %32 : vector<256x128xi32>
    %cst_12 = arith.constant 0xFF800000 : f32
    %34 = vector.broadcast %cst_12 : f32 to vector<256x128xf32>
    %35 = arith.select %33, %30, %34 : vector<256x128xi1>, vector<256x128xf32>
    %cst_13 = arith.constant dense<0xFF800000> : vector<256xf32>
    %36 = vector.multi_reduction <maximumf>, %35, %cst_13 [1] : vector<256x128xf32> to vector<256xf32>
    %37 = vector.shape_cast %36 : vector<256xf32> to vector<256x1xf32>
    %38 = vector.broadcast %37 : vector<256x1xf32> to vector<256x128xf32>
    %39 = arith.subf %30, %38 : vector<256x128xf32>
    %40 = math.exp %39 : vector<256x128xf32>
    %cst_14 = arith.constant 0.000000e+00 : f32
    %41 = vector.broadcast %cst_14 : f32 to vector<256x128xf32>
    %42 = arith.select %33, %40, %41 : vector<256x128xi1>, vector<256x128xf32>
    %cst_15 = arith.constant dense<0.000000e+00> : vector<256xf32>
    %43 = vector.multi_reduction <add>, %42, %cst_15 [1] : vector<256x128xf32> to vector<256xf32>
    %44 = vector.shape_cast %43 : vector<256xf32> to vector<256x1xf32>
    %45 = math.log %44 : vector<256x1xf32>
    %46 = vector.broadcast %45 : vector<256x1xf32> to vector<256x128xf32>
    %47 = arith.subf %39, %46 : vector<256x128xf32>
    %48 = vector.extract_strided_slice %47 {offsets = [0, 0], sizes = [128, 63], strides = [1, 1]} : vector<256x128xf32> to vector<128x63xf32>
    %49 = vector.extract_strided_slice %47 {offsets = [128, 0], sizes = [128, 63], strides = [1, 1]} : vector<256x128xf32> to vector<128x63xf32>
    %50 = tpu.concatenate %48, %49 in 1 : vector<128x63xf32>, vector<128x63xf32> -> vector<128x126xf32>
    %c0_16 = arith.constant 0 : index
    %c0_17 = arith.constant 0 : index
    %51 = vector.load %arg7[%c0_16, %c0_17] : memref<128x126xf32, #tpu.memory_space<vmem>>, vector<128x126xf32>
    tpu.vector_store %arg7[%c0_16, %c0_17], %50 {strides = array<i32>} : memref<128x126xf32, #tpu.memory_space<vmem>>, vector<128x126xf32>,
    %52 = vector.extract_strided_slice %30 {offsets = [0, 64], sizes = [256, 8], strides = [1, 1]} : vector<256x128xf32> to vector<256x8xf32>
    %53 = vector.broadcast %14 : vector<256x1xf32> to vector<256x8xf32>
    %54 = arith.mulf %52, %53 : vector<256x8xf32>
    %55 = vector.shape_cast %54 : vector<256x8xf32> to vector<2x128x8xf32>
    %c0_18 = arith.constant 0 : index
    %c0_19 = arith.constant 0 : index
    %c0_20 = arith.constant 0 : index
    %56 = vector.load %arg8[%c0_18, %c0_19, %c0_20] : memref<2x128x8xf32, #tpu.memory_space<vmem>>, vector<2x128x8xf32>
    tpu.vector_store %arg8[%c0_18, %c0_19, %c0_20], %55 {strides = array<i32>} : memref<2x128x8xf32, #tpu.memory_space<vmem>>, vector<2x128x8xf32>,
    return
  }
  func.func @transform_0(%arg0: i32, %arg1: memref<2xi32, #tpu.memory_space<smem>>) -> (i32, i32, i32) {
    %c0_i32 = arith.constant 0 : i32
    %c0_i32_0 = arith.constant 0 : i32
    %c0_i32_1 = arith.constant 0 : i32
    return %c0_i32, %arg0, %c0_i32_0 : i32, i32, i32
  }
  func.func @transform_1(%arg0: i32, %arg1: memref<2xi32, #tpu.memory_space<smem>>) -> (i32, i32) {
    %c0_i32 = arith.constant 0 : i32
    %c0_i32_0 = arith.constant 0 : i32
    %c0_i32_1 = arith.constant 0 : i32
    return %c0_i32, %c0_i32_0 : i32, i32
  }
  func.func @transform_2(%arg0: i32, %arg1: memref<2xi32, #tpu.memory_space<smem>>) -> (i32, i32) {
    %c0_i32 = arith.constant 0 : i32
    %c0_i32_0 = arith.constant 0 : i32
    %c0_i32_1 = arith.constant 0 : i32
    return %c0_i32, %c0_i32_0 : i32, i32
  }
  func.func @transform_3(%arg0: i32, %arg1: memref<2xi32, #tpu.memory_space<smem>>) -> (i32, i32) {
    %c0_i32 = arith.constant 0 : i32
    %c0_i32_0 = arith.constant 0 : i32
    %c0_i32_1 = arith.constant 0 : i32
    return %c0_i32, %c0_i32_0 : i32, i32
  }
  func.func @transform_4(%arg0: i32, %arg1: memref<2xi32, #tpu.memory_space<smem>>) -> (i32, i32) {
    %c0_i32 = arith.constant 0 : i32
    %c0_i32_0 = arith.constant 0 : i32
    %c0_i32_1 = arith.constant 0 : i32
    return %c0_i32, %c0_i32_0 : i32, i32
  }
  func.func @transform_5(%arg0: i32, %arg1: memref<2xi32, #tpu.memory_space<smem>>) -> (i32, i32) {
    %c0_i32 = arith.constant 0 : i32
    %c0_i32_0 = arith.constant 0 : i32
    return %arg0, %c0_i32 : i32, i32
  }
  func.func @transform_6(%arg0: i32, %arg1: memref<2xi32, #tpu.memory_space<smem>>) -> (i32, i32, i32) {
    %c0_i32 = arith.constant 0 : i32
    %c0_i32_0 = arith.constant 0 : i32
    %c0_i32_1 = arith.constant 0 : i32
    return %c0_i32, %arg0, %c0_i32_0 : i32, i32, i32
  }
}

</mosaic_0001>

<bundles_post_ra>
// kernel: encodec_forward.1
= control target key start
LH: loop header
LB: loop body
LE: loop exit
PB: predicated region body
PF: predicated region fallthrough
CT: control target
= control target key end

     0   :  { %s4275_s0 = inlined_call_operand.vmem [shape: s32[2], index: 0, kind: input, shape index: {}]   ;;  %s4276_s1 = inlined_call_operand.vmem [shape: bf16[2,256,8], index: 1, kind: input, shape index: {}]   ;;  %s4277_s2 = inlined_call_operand.vmem [shape: bf16[8,128], index: 2, kind: input, shape index: {}]   ;;  %s4278_s3 = inlined_call_operand.vmem [shape: f32[1,128], index: 3, kind: input, shape index: {}, may-alias: {3,5}]   ;;  %s4279_s4 = inlined_call_operand.vmem [shape: bf16[128,128], index: 4, kind: input, shape index: {}]   ;;  %s4280_s5 = inlined_call_operand.vmem [shape: f32[1,128], index: 5, kind: input, shape index: {}, may-alias: {3,5}]   ;;  %s4281_s6 = inlined_call_operand.vmem [shape: f32[256,126], index: 6, kind: output, shape index: {0}]   ;;  %s4282_s7 = inlined_call_operand.vmem [shape: f32[2,256,8], index: 7, kind: output, shape index: {1}]  }
   0x1   :  { %s13_s26 = sshll.u32 %s4275_s0, 4  ;;  %s14_s26 = int_to_ptr.vmem [resolvable:$true] %s13_s26 }
   0x2   :  { %s2872_s27 = scalar_lea.vmem %s14_s26, 16  ;;  %p2877_p1 = scmp.lt.s32.totalorder %s14_s26, %s14_s26 }
   0x3   :  { %p2873_p0 = scmp.ne.s32.totalorder %s14_s26, %s2872_s27  ;;  %p2878_p2 = scmp.lt.s32.totalorder %s2872_s27, %s2872_s27 }
   0x5   :  { %p2879_p3 = por %p2878_p2, %p2877_p1 }
   0x7   :  { %p2880_p4 = pnand %p2879_p3, %p2873_p0 }
   0x9   :  { %2883 = shalt.err (!%p2880_p4)  }
   0xa   :  { %s2910_s28 = smov [#allocation3]  }
   0xb   :  { %16 = dma.vmem_to_smem %s14_s26, 16, %s2910_s28, [#allocation2] }
   0xc   :  { %2896 = dma.done.wait [#allocation2], 16 }
   0xd   :  { %2897 = vsyncadd [#allocation2], 4294967280 }
   0xe   :  { %18 = sfence }
   0xf   :  { %s2958_s29 = smov 0   ;;  %s2960_s30 = smov 0  }
  0x10   :  { %s2962_s8 = smov 0  }
  0x11 LB: > { %s2974_s0 = sadd.s32 4294967295, %s2908_s8   ;;  %s2977_s9 = sadd.s32 1, %s2908_s8   ;;  %s2908_s8 = sphi %s2962_s8, %s4353_s8   ;;  %s2904_s30 = sphi %s2960_s30, %s4352_s30   ;;  %s2900_s29 = sphi %s2958_s29, %s4351_s29  }
  0x12   : > { %s28_s10 = ssub.s32 %s2908_s8, %s2977_s9  ;;  %s31_s11 = sadd.s32 1, %s2904_s30 }
  0x13   : > { %p29_p5 = scmp.eq.s32.totalorder %s28_s10, 0  ;;  %p38_p6 = scmp.ne.s32.totalorder %s2904_s30, %s2900_s29 }
  0x14   : > { %p39_p7 = scmp.eq.s32.totalorder %s2908_s8, 0  ;;  %p178_p8 = scmp.eq.s32.totalorder %s2974_s0, 1 }
  0x15   : > { %s2987_s12 = scalar_select %p29_p5, %s2904_s30, %s31_s11  }
  0x16   : > { %p40_p9 = por %p39_p7, %p38_p6  ;;  %p2989_p10 = por %p178_p8, %p38_p6 }
  0x17   : > { %p2313_p11 = scmp.ge.s32.totalorder %s2908_s8, 2 }
  0x19   : > { %212 = sbr.rel (%p2313_p11) target bundleno = 44 (0x2c), region = 32 }
  0x20   : > { %215 = sbr.rel (!%p40_p9) target bundleno = 44 (0x2c), region = 36  ;;  %s217_s14 = sand.u32 (%p40_p9), 1, %s2904_s30  }
  0x21   : > { %s2403_s15 = sshll.u32 (%p40_p9), %s2908_s8, 6  ;;  %s2314_s16 = sshll.u32 (%p40_p9), %s217_s14, 7 }
  0x22   : > { %s2999_s19 = scalar_lea.vmem (%p40_p9), %s4276_s1, %s2403_s15  ;;  %s219_s20 = scalar_lea.vmem (%p40_p9), [#allocation4], %s2314_s16 }
  0x23   : > { %v238_v0 = vld [vmem:[%s2999_s19] sm:$0xff] (%p40_p9)   ;;  %v242_v1 = vld [vmem:[%s2999_s19 + $0x8] sm:$0xff] (%p40_p9)   ;;  %v246_v2 = vld [vmem:[%s2999_s19 + $0x10] sm:$0xff] (%p40_p9)  }
  0x24   : > { %239 = vst [vmem:[%s219_s20] sm:$0xff] (%p40_p9), %v238_v0   ;;  %243 = vst [vmem:[%s219_s20 + $0x8] sm:$0xff] (%p40_p9), %v242_v1   ;;  %v250_v3 = vld [vmem:[%s2999_s19 + $0x18] sm:$0xff] (%p40_p9)   ;;  %v254_v4 = vld [vmem:[%s2999_s19 + $0x20] sm:$0xff] (%p40_p9)  }
  0x25   : > { %247 = vst [vmem:[%s219_s20 + $0x10] sm:$0xff] (%p40_p9), %v246_v2   ;;  %v258_v5 = vld [vmem:[%s2999_s19 + $0x28] sm:$0xff] (%p40_p9)   ;;  %251 = vst [vmem:[%s219_s20 + $0x18] sm:$0xff] (%p40_p9), %v250_v3   ;;  %v262_v6 = vld [vmem:[%s2999_s19 + $0x30] sm:$0xff] (%p40_p9)  }
  0x26   : > { %255 = vst [vmem:[%s219_s20 + $0x20] sm:$0xff] (%p40_p9), %v254_v4   ;;  %259 = vst [vmem:[%s219_s20 + $0x28] sm:$0xff] (%p40_p9), %v258_v5   ;;  %v266_v7 = vld [vmem:[%s2999_s19 + $0x38] sm:$0xff] (%p40_p9)   ;;  %v270_v8 = vld [vmem:[%s2999_s19 + $0x80] sm:$0xff] (%p40_p9)  }
  0x27   : > { %263 = vst [vmem:[%s219_s20 + $0x30] sm:$0xff] %v262_v6   ;;  %267 = vst [vmem:[%s219_s20 + $0x38] sm:$0xff] %v266_v7   ;;  %v274_v9 = vld [vmem:[%s2999_s19 + $0x88] sm:$0xff]   ;;  %v278_v10 = vld [vmem:[%s2999_s19 + $0x90] sm:$0xff]  }
  0x28   : > { %271 = vst [vmem:[%s219_s20 + $0x40] sm:$0xff] %v270_v8   ;;  %v282_v11 = vld [vmem:[%s2999_s19 + $0x98] sm:$0xff]   ;;  %275 = vst [vmem:[%s219_s20 + $0x48] sm:$0xff] %v274_v9   ;;  %v286_v12 = vld [vmem:[%s2999_s19 + $0xa0] sm:$0xff]  }
  0x29   : > { %279 = vst [vmem:[%s219_s20 + $0x50] sm:$0xff] %v278_v10   ;;  %283 = vst [vmem:[%s219_s20 + $0x58] sm:$0xff] %v282_v11   ;;  %v290_v13 = vld [vmem:[%s2999_s19 + $0xa8] sm:$0xff]   ;;  %v294_v14 = vld [vmem:[%s2999_s19 + $0xb0] sm:$0xff]  }
  0x2a   : > { %287 = vst [vmem:[%s219_s20 + $0x60] sm:$0xff] %v286_v12   ;;  %291 = vst [vmem:[%s219_s20 + $0x68] sm:$0xff] %v290_v13   ;;  %v298_v15 = vld [vmem:[%s2999_s19 + $0xb8] sm:$0xff]  }
  0x2b   : > { %295 = vst [vmem:[%s219_s20 + $0x70] sm:$0xff] %v294_v14   ;;  %299 = vst [vmem:[%s219_s20 + $0x78] sm:$0xff] %v298_v15  }
  0x2c PF: > { %p2317_p12 = scmp.ge.s32.totalorder %s2908_s8, 1  ;;  %p387_p13 = scmp.lt.s32.totalorder %s2908_s8, 3 }
  0x2e   : > { %p388_p0 = pnand %p2317_p12, %p387_p13 }
  0x30   : > { %391 = sbr.rel (%p388_p0) target bundleno = 1314 (0x522), region = 77 }
  0x37   : > { %v603_v16 = vld [vmem:[%s4277_s2] sm:$0xf]  ;;  %vm740_vm0 = vcmask 1043456   ;;  %s394_s23 = sand.u32 1, %s2900_s29   ;;  %v437_v17 = vlaneseq  ;;  %v2911_v19 = vmov 0   ;;  %s2322_s25 = sshll.u32 %s2974_s0, 7 }
  0x38   : > { %2544 = vmatprep.subr.msk.bf16.mxu0 %vm740_vm0, %v603_v16  ;;  %v742_v18 = vsel %vm740_vm0, %v603_v16, 0  ;;  %s2318_s24 = sshll.u32 %s394_s23, 7  ;;  %2574 = vset.pattern.permute.xlu0 %v2911_v19  ;;  %vm691_vm1 = vcmask 64512   ;;  %s471_s26 = sld [smem:[#allocation3]]  ;;  %v2672_v21 = vld [vmem:[%s4279_s4] sm:$0xff]   ;;  %v3037_v23 = vstv %s2322_s25  ;;  %v2912_v36 = vmov 0.0  }
  0x39   : > { %2447 = vmatpush3.bf16.msra.mxu0 %v742_v18  ;;  %2585 = vset.pattern.permute.xlu1 %v2911_v19  ;;  %v3027_v20 = vshrl.u32 %v437_v17, 7  ;;  %s3032_s8 = scalar_lea.vmem [#allocation4], %s2318_s24  ;;  %s2339_s10 = sld [smem:[#allocation3 + $0x1]]  ;;  %v2673_v11 = vld [vmem:[%s4279_s4 + $0x8] sm:$0xff]  }
  0x3a   : > { %v2656_v22 = vld [vmem:[%s3032_s8] sm:$0xff]   ;;  %v2657_v24 = vld [vmem:[%s3032_s8 + $0x8] sm:$0xff]   ;;  %2480 = vmatprep.subr.bf16.mxu0 %v2672_v21  ;;  %2528 = vmatprep.subr.bf16.mxu1 %v2672_v21  ;;  %v2658_v26 = vld [vmem:[%s3032_s8 + $0x10] sm:$0xff]   ;;  %s2913_s15 = smov 64   ;;  %s2319_s16 = sshll.u32 %s394_s23, 8 }
  0x3b   : > { %v442_v25 = vadd.s32 32, %v3027_v20  ;;  %2448 = vmatprep.mubr.msk.bf16.mxu0 %vm691_vm1, %v2656_v22  ;;  %v443_v27 = vadd.s32 40, %v3027_v20  ;;  %2536 = vmatpush3.bf16.msra.mxu1 %v2672_v21  ;;  %v446_v30 = vadd.s32 64, %v3027_v20  ;;  %v447_v32 = vadd.s32 72, %v3027_v20  ;;  %v2659_v35 = vld [vmem:[%s3032_s8 + $0x18] sm:$0xff]   ;;  %v2660_v39 = vld [vmem:[%s3032_s8 + $0x20] sm:$0xff]  }
  0x3c   : > { %2449 = vmatmul.mubr.msk.bf16.vlgmr.msra.gmra.mrb[0].mxu0 %vm691_vm1, %v2657_v24  ;;  %v444_v34 = vadd.s32 48, %v3027_v20  ;;  %v445_v46 = vadd.s32 56, %v3027_v20  ;;  %v448_v48 = vadd.s32 80, %v3027_v20  ;;  %v449_v49 = vadd.s32 88, %v3027_v20  ;;  %v2661_v56 = vld [vmem:[%s3032_s8 + $0x28] sm:$0xff]   ;;  %v2662_v60 = vld [vmem:[%s3032_s8 + $0x30] sm:$0xff]   ;;  %2529 = vmatprep.subr.bf16.mxu1 %v2673_v11 }
  0x3d   : > { %v3046_v28 = vadd.s32 %v3037_v23, %v442_v25  ;;  %2452 = vmatprep.mubr.msk.bf16.mxu0 %vm691_vm1, %v2658_v26  ;;  %v3050_v29 = vadd.s32 %v3037_v23, %v443_v27  ;;  %2481 = vmatpush3.bf16.msra.mxu0 %v2672_v21  ;;  %v3061_v33 = vadd.s32 %v3037_v23, %v446_v30  ;;  %v450_v54 = vadd.s32 96, %v3027_v20  ;;  %v2663_v19 = vld [vmem:[%s3032_s8 + $0x38] sm:$0xff]   ;;  %v2664_v24 = vld [vmem:[%s3032_s8 + $0x40] sm:$0xff]   ;;  %s3590_s17 = scalar_lea.vmem [#allocation5], %s2319_s16  ;;  %s2914_s29 = smov 63  }
  0x3e   : > { %v3053_v31 = vstv %s471_s26  ;;  %v3067_v38 = vadd.s32 %v3037_v23, %v447_v32  ;;  %v3074_v41 = vadd.s32 %v3037_v23, %v444_v34  ;;  %v3089_v50 = vadd.s32 %v3037_v23, %v445_v46  ;;  %2482 = vmatprep.subr.bf16.mxu0 %v2673_v11  ;;  %s2320_s23 = sshll.u32 %s2974_s0, 4  ;;  %s4199_s26 = scalar_lea.vmem (%p2989_p10), %s4282_s7, %s2322_s25 }
  0x3f   : > { %vm477_vm2 = vcmp.lt.s32.totalorder %v3046_v28, %v3053_v31  ;;  %vm478_vm3 = vcmp.lt.s32.totalorder %v3050_v29, %v3053_v31  ;;  %vm481_vm4 = vcmp.lt.s32.totalorder %v3061_v33, %v3053_v31  ;;  %v3093_v51 = vadd.s32 %v3037_v23, %v3027_v20  ;;  %2537 = vmatpush3.bf16.msra.mxu1 %v2673_v11  ;;  %p429_p1 = scmp.lt.s32.totalorder %s2320_s23, 31 }
  0x40   : > { %v2327_v37 = vsel %vm477_vm2, 1.0, %v2912_v36  ;;  %v2328_v40 = vsel %vm478_vm3, 1.0, %v2912_v36  ;;  %vm482_vm5 = vcmp.lt.s32.totalorder %v3067_v38, %v3053_v31  ;;  %v2331_v43 = vsel %vm481_vm4, 1.0, %v2912_v36 }
  0x41   : > { %v2575_v42 = vpack.i.bf16 %v2328_v40, %v2327_v37  ;;  %v2332_v44 = vsel %vm482_vm5, 1.0, %v2912_v36  ;;  %vm479_vm6 = vcmp.lt.s32.totalorder %v3074_v41, %v3053_v31  ;;  %v3096_v52 = vadd.s32 %v3037_v23, %v448_v48  ;;  %2483 = vmatpush3.bf16.msra.mxu0 %v2673_v11  ;;  %v3278_v11 = vld [vmem:[%s4278_s3] ss:$0 sm:$0xff]  ;;  %s4355_s23 = smov (!%p429_p1, %s2320_s23), 31 }
  0x42   : > { %v2586_v45 = vpack.i.bf16 %v2332_v44, %v2331_v43  ;;  %v2329_v47 = vsel %vm479_vm6, 1.0, %v2912_v36  ;;  %v3099_v53 = vadd.s32 %v3037_v23, %v449_v49  ;;  %v451_v55 = vadd.s32 104, %v3027_v20  ;;  %v2666_v43 = vld [vmem:[%s3032_s8 + $0x50] sm:$0xff]   ;;  %s2321_s18 = sshll.u32 %s4355_s23, 3 }
  0x43   : > { %2576 = vperm.xlu0 %2574, %v2575_v42   ;;  %vm480_vm7 = vcmp.lt.s32.totalorder %v3089_v50, %v3053_v31  ;;  %v452_v57 = vadd.s32 112, %v3027_v20  ;;  %v453_v58 = vadd.s32 120, %v3027_v20  ;;  %v439_v59 = vadd.s32 8, %v3027_v20  ;;  %s4116_s21 = scalar_lea.vmem %s4281_s6, %s2321_s18 }
  0x44   : > { %2453 = vmatmul.mubr.msk.bf16.gmra.mrb[4].mxu0 %vm691_vm1, %v2659_v35  ;;  %2587 = vperm.xlu1 %2585, %v2586_v45   ;;  %v2330_v61 = vsel %vm480_vm7, 1.0, %v2912_v36  ;;  %vm483_vm8 = vcmp.lt.s32.totalorder %v3096_v52, %v3053_v31  ;;  %vm484_vm9 = vcmp.lt.s32.totalorder %v3099_v53, %v3053_v31  ;;  %v3116_v62 = vadd.s32 %v3037_v23, %v450_v54  ;;  %v2667_v54 = vld [vmem:[%s3032_s8 + $0x58] sm:$0xff]  }
  0x45   : > { %2456 = vmatprep.mubr.msk.bf16.mxu0 %vm691_vm1, %v2660_v39  ;;  %v2580_v63 = vpack.i.bf16 %v2330_v61, %v2329_v47  ;;  %v2333_v0 = vsel %vm483_vm8, 1.0, %v2912_v36  ;;  %v2334_v1 = vsel %vm484_vm9, 1.0, %v2912_v36  ;;  %v3121_v2 = vadd.s32 %v3037_v23, %v451_v55  ;;  %v2665_v39 = vld [vmem:[%s3032_s8 + $0x48] sm:$0xff]   ;;  %v2670_v61 = vld [vmem:[%s3032_s8 + $0x70] sm:$0xff]  }
  0x46   : > { %v2591_v3 = vpack.i.bf16 %v2334_v1, %v2333_v0  ;;  %vm485_vm10 = vcmp.lt.s32.totalorder %v3116_v62, %v3053_v31  ;;  %v3126_v4 = vadd.s32 %v3037_v23, %v452_v57  ;;  %v3129_v5 = vadd.s32 %v3037_v23, %v453_v58  ;;  %v2668_v58 = vld [vmem:[%s3032_s8 + $0x60] sm:$0xff]   ;;  %v2679_v0 = vld [vmem:[%s4279_s4 + $0x38] sm:$0xff]  }
  0x47   : > { %2581 = vperm.xlu0 %2574, %v2580_v63   ;;  %vm486_vm11 = vcmp.lt.s32.totalorder %v3121_v2, %v3053_v31  ;;  %v2335_v6 = vsel %vm485_vm10, 1.0, %v2912_v36  ;;  %v3136_v7 = vadd.s32 %v3037_v23, %v439_v59  ;;  %v440_v8 = vadd.s32 16, %v3027_v20  ;;  %v2676_v59 = vld [vmem:[%s4279_s4 + $0x20] sm:$0xff]   ;;  %v2678_v63 = vld [vmem:[%s4279_s4 + $0x30] sm:$0xff]  }
  0x48   : > { %2592 = vperm.xlu1 %2585, %v2591_v3   ;;  %v2336_v9 = vsel %vm486_vm11, 1.0, %v2912_v36  ;;  %vm487_vm12 = vcmp.lt.s32.totalorder %v3126_v4, %v3053_v31  ;;  %vm488_vm13 = vcmp.lt.s32.totalorder %v3129_v5, %v3053_v31  ;;  %v3145_v10 = vstv %s2339_s10 }
  0x49   : > { %v2596_v12 = vpack.i.bf16 %v2336_v9, %v2335_v6  ;;  %v2337_v13 = vsel %vm487_vm12, 1.0, %v2912_v36  ;;  %v2338_v14 = vsel %vm488_vm13, 1.0, %v2912_v36  ;;  %vm523_vm14 = vcmp.lt.s32.totalorder %v3093_v51, %v3145_v10 }
  0x4a   : > { %v2601_v15 = vpack.i.bf16 %v2338_v14, %v2337_v13  ;;  %vm524_vm15 = vcmp.lt.s32.totalorder %v3136_v7, %v3145_v10  ;;  %v2340_v16 = vsel %vm523_vm14, 1.0, %v2912_v36  ;;  %v441_v18 = vadd.s32 24, %v3027_v20 }
  0x4b   : > { %2597 = vperm.xlu0 %2574, %v2596_v12   ;;  %v2341_v21 = vsel %vm524_vm15, 1.0, %v2912_v36  ;;  %v3161_v22 = vadd.s32 %v3037_v23, %v440_v8  ;;  %vm527_vm0 = vcmp.lt.s32.totalorder %v3046_v28, %v3145_v10  ;;  %vm528_vm2 = vcmp.lt.s32.totalorder %v3050_v29, %v3145_v10 }
  0x4c   : > { %2457 = vmatmul.mubr.msk.bf16.gmra.mrb[8].mxu0 %vm691_vm1, %v2661_v56  ;;  %2602 = vperm.xlu1 %2585, %v2601_v15   ;;  %v2606_v25 = vpack.i.bf16 %v2341_v21, %v2340_v16  ;;  %v3169_v20 = vadd.s32 %v3037_v23, %v441_v18  ;;  %v2344_v26 = vsel %vm527_vm0, 1.0, %v2912_v36  ;;  %v2345_v27 = vsel %vm528_vm2, 1.0, %v2912_v36 }
  0x4d   : > { %2460 = vmatprep.mubr.msk.bf16.mxu0 %vm691_vm1, %v2662_v60  ;;  %vm525_vm3 = vcmp.lt.s32.totalorder %v3161_v22, %v3145_v10  ;;  %vm529_vm4 = vcmp.lt.s32.totalorder %v3074_v41, %v3145_v10  ;;  %vm530_vm5 = vcmp.lt.s32.totalorder %v3089_v50, %v3145_v10  ;;  %v2616_v28 = vpack.i.bf16 %v2345_v27, %v2344_v26  ;;  %v2669_v60 = vld [vmem:[%s3032_s8 + $0x68] sm:$0xff]  }
  0x4e   : > { %vm526_vm6 = vcmp.lt.s32.totalorder %v3169_v20, %v3145_v10  ;;  %v2342_v23 = vsel %vm525_vm3, 1.0, %v2912_v36  ;;  %v2346_v29 = vsel %vm529_vm4, 1.0, %v2912_v36  ;;  %v2347_v32 = vsel %vm530_vm5, 1.0, %v2912_v36 }
  0x4f   : > { %2607 = vperm.xlu0 %2574, %v2606_v25   ;;  %v2343_v30 = vsel %vm526_vm6, 1.0, %v2912_v36  ;;  %vm531_vm7 = vcmp.lt.s32.totalorder %v3061_v33, %v3145_v10  ;;  %vm532_vm8 = vcmp.lt.s32.totalorder %v3067_v38, %v3145_v10  ;;  %vm533_vm9 = vcmp.lt.s32.totalorder %v3096_v52, %v3145_v10  ;;  %v2674_v38 = vld [vmem:[%s4279_s4 + $0x10] sm:$0xff]  }
  0x50   : > { %v2611_v34 = vpack.i.bf16 %v2343_v30, %v2342_v23  ;;  %v2348_v35 = vsel %vm531_vm7, 1.0, %v2912_v36  ;;  %v2349_v37 = vsel %vm532_vm8, 1.0, %v2912_v36  ;;  %vm534_vm10 = vcmp.lt.s32.totalorder %v3099_v53, %v3145_v10  ;;  %2484 = vmatprep.subr.bf16.mxu0 %v2674_v38  ;;  %2530 = vmatprep.subr.bf16.mxu1 %v2674_v38  ;;  %v2675_v53 = vld [vmem:[%s4279_s4 + $0x18] sm:$0xff]  }
  0x51   : > { %vm535_vm11 = vcmp.lt.s32.totalorder %v3116_v62, %v3145_v10  ;;  %v2621_v33 = vpack.i.bf16 %v2347_v32, %v2346_v29  ;;  %vm536_vm12 = vcmp.lt.s32.totalorder %v3121_v2, %v3145_v10  ;;  %v2626_v40 = vpack.i.bf16 %v2349_v37, %v2348_v35  ;;  %2485 = vmatpush3.bf16.msra.mxu0 %v2674_v38  ;;  %v2671_v62 = vld [vmem:[%s3032_s8 + $0x78] sm:$0xff]  }
  0x52   : > { %2612 = vperm.xlu1 %2585, %v2611_v34   ;;  %v2350_v41 = vsel %vm533_vm9, 1.0, %v2912_v36  ;;  %v2351_v42 = vsel %vm534_vm10, 1.0, %v2912_v36  ;;  %v2352_v44 = vsel %vm535_vm11, 1.0, %v2912_v36  ;;  %v2353_v45 = vsel %vm536_vm12, 1.0, %v2912_v36  ;;  %2538 = vmatpush3.bf16.msra.mxu1 %v2674_v38 }
  0x53   : > { %2617 = vperm.xlu0 %2574, %v2616_v28   ;;  %vm537_vm13 = vcmp.lt.s32.totalorder %v3126_v4, %v3145_v10  ;;  %vm538_vm14 = vcmp.lt.s32.totalorder %v3129_v5, %v3145_v10  ;;  %vm473_vm15 = vcmp.lt.s32.totalorder %v3093_v51, %v3053_v31  ;;  %vm474_vm0 = vcmp.lt.s32.totalorder %v3136_v7, %v3053_v31 }
  0x54   : > { %2461 = vmatmul.mubr.msk.bf16.gmra.mrb[12].mxu0 %vm691_vm1, %v2663_v19  ;;  %v2631_v46 = vpack.i.bf16 %v2351_v42, %v2350_v41  ;;  %v2636_v47 = vpack.i.bf16 %v2353_v45, %v2352_v44  ;;  %v2354_v48 = vsel %vm537_vm13, 1.0, %v2912_v36  ;;  %v2355_v49 = vsel %vm538_vm14, 1.0, %v2912_v36  ;;  %2486 = vmatprep.subr.bf16.mxu0 %v2675_v53 }
  0x55   : > { %2464 = vmatprep.mubr.msk.bf16.mxu0 %vm691_vm1, %v2664_v24  ;;  %v2323_v50 = vsel %vm473_vm15, 1.0, %v2912_v36  ;;  %v2324_v51 = vsel %vm474_vm0, 1.0, %v2912_v36  ;;  %vm475_vm2 = vcmp.lt.s32.totalorder %v3161_v22, %v3053_v31  ;;  %vm476_vm3 = vcmp.lt.s32.totalorder %v3169_v20, %v3053_v31  ;;  %2531 = vmatprep.subr.bf16.mxu1 %v2675_v53 }
  0x56   : > { %2622 = vperm.xlu1 %2585, %v2621_v33   ;;  %v2641_v52 = vpack.i.bf16 %v2355_v49, %v2354_v48  ;;  %v2646_v55 = vpack.i.bf16 %v2324_v51, %v2323_v50  ;;  %v2325_v56 = vsel %vm475_vm2, 1.0, %v2912_v36  ;;  %v2326_v57 = vsel %vm476_vm3, 1.0, %v2912_v36  ;;  %2487 = vmatpush3.bf16.msra.mxu0 %v2675_v53  ;;  %v2677_v36 = vld [vmem:[%s4279_s4 + $0x28] sm:$0xff]  }
  0x57   : > { %2627 = vperm.xlu0 %2574, %v2626_v40   ;;  %2539 = vmatpush3.bf16.msra.mxu1 %v2675_v53  ;;  %v2651_v31 = vpack.i.bf16 %v2326_v57, %v2325_v56  ;;  %vm1828_vm5 = vcmask 515072   ;;  %vm1845_vm6 = vcmask 1031168  }
  0x58   : > { %2488 = vmatprep.subr.bf16.mxu0 %v2676_v59  ;;  %2532 = vmatprep.subr.bf16.mxu1 %v2676_v59 }
  0x5a   : > { %2632 = vperm.xlu1 %2585, %v2631_v46   ;;  %2489 = vmatpush3.bf16.msra.mxu0 %v2676_v59 }
  0x5b   : > { %2637 = vperm.xlu0 %2574, %v2636_v47   ;;  %2540 = vmatpush3.bf16.msra.mxu1 %v2676_v59 }
  0x5c   : > { %2465 = vmatmul.mubr.msk.bf16.gmra.mrb[16].mxu0 %vm691_vm1, %v2665_v39  ;;  %2490 = vmatprep.subr.bf16.mxu0 %v2677_v36 }
  0x5d   : > { %2468 = vmatprep.mubr.msk.bf16.mxu0 %vm691_vm1, %v2666_v43  ;;  %2533 = vmatprep.subr.bf16.mxu1 %v2677_v36 }
  0x5e   : > { %2642 = vperm.xlu1 %2585, %v2641_v52   ;;  %2491 = vmatpush3.bf16.msra.mxu0 %v2677_v36 }
  0x5f   : > { %2647 = vperm.xlu0 %2574, %v2646_v55   ;;  %2541 = vmatpush3.bf16.msra.mxu1 %v2677_v36 }
  0x60   : > { %2492 = vmatprep.subr.bf16.mxu0 %v2678_v63  ;;  %2534 = vmatprep.subr.bf16.mxu1 %v2678_v63 }
  0x62   : > { %2652 = vperm.xlu1 %2585, %v2651_v31   ;;  %2493 = vmatpush3.bf16.msra.mxu0 %v2678_v63 }
  0x63   : > { %2542 = vmatpush3.bf16.msra.mxu1 %v2678_v63  ;;  %2494 = vmatprep.subr.bf16.mxu0 %v2679_v0 }
  0x64   : > { %2469 = vmatmul.mubr.msk.bf16.gmra.mrb[20].mxu0 %vm691_vm1, %v2667_v54  ;;  %2535 = vmatprep.subr.bf16.mxu1 %v2679_v0 }
  0x65   : > { %2472 = vmatprep.mubr.msk.bf16.mxu0 %vm691_vm1, %v2668_v58 }
  0x66   : > { %2495 = vmatpush3.bf16.msra.mxu0 %v2679_v0 }
  0x67   : > { %2543 = vmatpush3.bf16.msra.mxu1 %v2679_v0 }
  0x6c   : > { %2473 = vmatmul.mubr.msk.bf16.gmra.mrb[24].mxu0 %vm691_vm1, %v2669_v60 }
  0x6d   : > { %2476 = vmatprep.mubr.msk.bf16.mxu0 %vm691_vm1, %v2670_v61 }
  0x74   : > { %2477 = vmatmul.mubr.msk.bf16.gmra.mrb[28].mxu0 %vm691_vm1, %v2671_v62 }
  0xc2   : > { %v3257_v2 = vpop.permute.xlu0 %2576 }
  0xc3   : > { %v3255_v1 = vpop.permute.xlu1 %2587  ;;  %v2579_v62 = vunpack.i.h.bf16 %v3257_v2  ;;  %v2578_v63 = vunpack.i.l.bf16 %v3257_v2 }
  0xc6   : > { %v3261_v4 = vpop.permute.xlu0 %2581 }
  0xc7   : > { %v3259_v3 = vpop.permute.xlu1 %2592  ;;  %v2584_v36 = vunpack.i.h.bf16 %v3261_v4  ;;  %v2583_v60 = vunpack.i.l.bf16 %v3261_v4 }
  0xca   : > { %v3265_v6 = vpop.permute.xlu0 %2597 }
  0xcb   : > { %v3263_v5 = vpop.permute.xlu1 %2602 }
  0xce   : > { %v3269_v8 = vpop.permute.xlu0 %2607 }
  0xd1   : > { %v3267_v7 = vpop.permute.xlu1 %2612 }
  0xd2   : > { %v3273_v10 = vpop.permute.xlu0 %2617 }
  0xd5   : > { %v3271_v9 = vpop.permute.xlu1 %2622 }
  0xd6   : > { %v3282_v13 = vpop.permute.xlu0 %2627 }
  0xd9   : > { %v3280_v12 = vpop.permute.xlu1 %2632 }
  0xda   : > { %v3290_v20 = vpop.permute.xlu0 %2637 }
  0xdd   : > { %v3288_v25 = vpop.permute.xlu1 %2642 }
  0xde   : > { %v3297_v35 = vpop.permute.xlu0 %2647 }
  0xdf   : > { %v2650_v42 = vunpack.i.h.bf16 %v3297_v35  ;;  %v2649_v43 = vunpack.i.l.bf16 %v3297_v35 }
  0xe1   : > { %v3294_v30 = vpop.permute.xlu1 %2652 }
  0xe2   : > { %v2655_v39 = vunpack.i.h.bf16 %v3294_v30  ;;  %v2654_v40 = vunpack.i.l.bf16 %v3294_v30 }
 0x10f   : > { %v2450_v14 = vpop.f32.mrb[0].mxu0 }
 0x110   : > { %v787_v15 = vadd.f32 %v2450_v14, %v3278_v11  ;;  %v778_v16 = vpop.f32.mrb[1].mxu0 }
 0x111   : > { %v779_v18 = vadd.f32 %v3278_v11, %v778_v16  ;;  %v2451_v19 = vpop.f32.mrb[2].mxu0 }
 0x112   : > { %2680 = vtanh.f32 %v787_v15  ;;  %v790_v21 = vadd.f32 %v2451_v19, %v3278_v11  ;;  %v781_v22 = vpop.f32.mrb[3].mxu0 }
 0x113   : > { %2682 = vtanh.f32 %v779_v18  ;;  %v782_v24 = vadd.f32 %v3278_v11, %v781_v22 }
 0x114   : > { %2684 = vtanh.f32 %v790_v21 }
 0x115   : > { %2686 = vtanh.f32 %v782_v24 }
 0x117   : > { %v2454_v26 = vpop.f32.mrb[4].mxu0 }
 0x118   : > { %v803_v27 = vadd.f32 %v2454_v26, %v3278_v11  ;;  %v794_v23 = vpop.f32.mrb[5].mxu0 }
 0x119   : > { %v795_v28 = vadd.f32 %v3278_v11, %v794_v23  ;;  %v2455_v29 = vpop.f32.mrb[6].mxu0 }
 0x11a   : > { %2688 = vtanh.f32 %v803_v27  ;;  %v806_v32 = vadd.f32 %v2455_v29, %v3278_v11  ;;  %v797_v34 = vpop.f32.mrb[7].mxu0 }
 0x11b   : > { %2690 = vtanh.f32 %v795_v28  ;;  %v798_v37 = vadd.f32 %v3278_v11, %v797_v34 }
 0x11c   : > { %v2681_v33 = vpop.eup %2680  ;;  %2692 = vtanh.f32 %v806_v32 }
 0x11d   : > { %v2683_v38 = vpop.eup %2682  ;;  %2694 = vtanh.f32 %v798_v37  ;;  %v1099_v45 = vmul.f32 %v2681_v33, %v2654_v40  ;;  %v2595_v33 = vunpack.i.h.bf16 %v3259_v3 }
 0x11e   : > { %v2685_v41 = vpop.eup %2684  ;;  %v1097_v50 = vmul.f32 %v2683_v38, %v2649_v43  ;;  %v2594_v38 = vunpack.i.l.bf16 %v3259_v3 }
 0x11f   : > { %v2687_v44 = vpop.eup %2686  ;;  %v1100_v46 = vmul.f32 %v2685_v41, %v2655_v39  ;;  %v2458_v47 = vpop.f32.mrb[8].mxu0 }
 0x120   : > { %v819_v48 = vadd.f32 %v2458_v47, %v3278_v11  ;;  %v810_v49 = vpop.f32.mrb[9].mxu0  ;;  %v1098_v51 = vmul.f32 %v2687_v44, %v2650_v42  ;;  %v2590_v44 = vunpack.i.h.bf16 %v3255_v1 }
 0x121   : > { %v811_v52 = vadd.f32 %v3278_v11, %v810_v49  ;;  %v2459_v53 = vpop.f32.mrb[10].mxu0  ;;  %v1130_v54 = vpack.c.bf16 %v1100_v46, %v1099_v45  ;;  %v4302_v45 = vunpack.i.l.bf16 %v3255_v1 }
 0x122   : > { %2696 = vtanh.f32 %v819_v48  ;;  %v822_v55 = vadd.f32 %v2459_v53, %v3278_v11  ;;  %v813_v56 = vpop.f32.mrb[11].mxu0  ;;  %v1129_v57 = vpack.c.bf16 %v1098_v51, %v1097_v50 }
 0x123   : > { %2698 = vtanh.f32 %v811_v52  ;;  %v814_v58 = vadd.f32 %v3278_v11, %v813_v56 }
 0x124   : > { %v2689_v31 = vpop.eup %2688  ;;  %2700 = vtanh.f32 %v822_v55  ;;  %2496 = vmatprep.mubr.bf16.mxu0 %v1129_v57 }
 0x125   : > { %v2691_v59 = vpop.eup %2690  ;;  %2702 = vtanh.f32 %v814_v58  ;;  %2497 = vmatmul.mubr.bf16.vlgmr.msra.gmra.mrb[32].mxu0 %v1130_v54  ;;  %v1103_v15 = vmul.f32 %v2689_v31, %v2583_v60 }
 0x126   : > { %v2693_v61 = vpop.eup %2692  ;;  %v1101_v21 = vmul.f32 %v2691_v59, %v2578_v63 }
 0x127   : > { %v2695_v0 = vpop.eup %2694  ;;  %v2462_v14 = vpop.f32.mrb[12].mxu0  ;;  %v1104_v16 = vmul.f32 %v2693_v61, %v2584_v36 }
 0x128   : > { %v835_v18 = vadd.f32 %v2462_v14, %v3278_v11  ;;  %v826_v19 = vpop.f32.mrb[13].mxu0  ;;  %v1102_v22 = vmul.f32 %v2695_v0, %v2579_v62  ;;  %v4300_v14 = vunpack.i.h.bf16 %v3263_v5 }
 0x129   : > { %v827_v24 = vadd.f32 %v3278_v11, %v826_v19  ;;  %v2463_v26 = vpop.f32.mrb[14].mxu0  ;;  %v1132_v27 = vpack.c.bf16 %v1104_v16, %v1103_v15  ;;  %v4298_v15 = vunpack.i.l.bf16 %v3263_v5  ;;  %v4301_v19 = vunpack.i.l.bf16 %v3265_v6 }
 0x12a   : > { %2704 = vtanh.f32 %v835_v18  ;;  %v838_v23 = vadd.f32 %v2463_v26, %v3278_v11  ;;  %v829_v28 = vpop.f32.mrb[15].mxu0  ;;  %v1131_v29 = vpack.c.bf16 %v1102_v22, %v1101_v21  ;;  %v2600_v18 = vunpack.i.h.bf16 %v3265_v6 }
 0x12b   : > { %2706 = vtanh.f32 %v827_v24  ;;  %v830_v32 = vadd.f32 %v3278_v11, %v829_v28 }
 0x12c   : > { %v2697_v34 = vpop.eup %2696  ;;  %2708 = vtanh.f32 %v838_v23  ;;  %2500 = vmatprep.mubr.bf16.mxu1 %v1131_v29 }
 0x12d   : > { %v2699_v37 = vpop.eup %2698  ;;  %2710 = vtanh.f32 %v830_v32  ;;  %2501 = vmatmul.mubr.bf16.vlgmr.msra.gmra.mrb[0].mxu1 %v1132_v27  ;;  %v1107_v48 = vmul.f32 %v2697_v34, %v2594_v38 }
 0x12e   : > { %v2701_v41 = vpop.eup %2700  ;;  %v1105_v52 = vmul.f32 %v2699_v37, %v4302_v45 }
 0x12f   : > { %v2703_v46 = vpop.eup %2702  ;;  %v2466_v47 = vpop.f32.mrb[16].mxu0  ;;  %v1108_v49 = vmul.f32 %v2701_v41, %v2595_v33 }
 0x130   : > { %v851_v50 = vadd.f32 %v2466_v47, %v3278_v11  ;;  %v842_v51 = vpop.f32.mrb[17].mxu0  ;;  %v1106_v53 = vmul.f32 %v2703_v46, %v2590_v44 }
 0x131   : > { %v843_v54 = vadd.f32 %v3278_v11, %v842_v51  ;;  %v2467_v55 = vpop.f32.mrb[18].mxu0  ;;  %v1134_v56 = vpack.c.bf16 %v1108_v49, %v1107_v48  ;;  %v4297_v51 = vunpack.i.h.bf16 %v3267_v7 }
 0x132   : > { %2712 = vtanh.f32 %v851_v50  ;;  %v854_v57 = vadd.f32 %v2467_v55, %v3278_v11  ;;  %v845_v58 = vpop.f32.mrb[19].mxu0  ;;  %v1133_v31 = vpack.c.bf16 %v1106_v53, %v1105_v52  ;;  %v4294_v52 = vunpack.i.l.bf16 %v3267_v7 }
 0x133   : > { %2714 = vtanh.f32 %v843_v54  ;;  %v846_v59 = vadd.f32 %v3278_v11, %v845_v58  ;;  %v4299_v54 = vunpack.i.h.bf16 %v3269_v8  ;;  %v4296_v55 = vunpack.i.l.bf16 %v3269_v8 }
 0x134   : > { %v2705_v61 = vpop.eup %2704  ;;  %2716 = vtanh.f32 %v854_v57  ;;  %2504 = vmatprep.mubr.bf16.mxu1 %v1133_v31 }
 0x135   : > { %v2707_v0 = vpop.eup %2706  ;;  %2718 = vtanh.f32 %v846_v59  ;;  %2505 = vmatmul.mubr.bf16.gmra.mrb[4].mxu1 %v1134_v56  ;;  %v1111_v24 = vmul.f32 %v2705_v61, %v4298_v15 }
 0x136   : > { %v2709_v16 = vpop.eup %2708  ;;  %v1109_v28 = vmul.f32 %v2707_v0, %v4301_v19 }
 0x137   : > { %v2711_v21 = vpop.eup %2710  ;;  %v2470_v22 = vpop.f32.mrb[20].mxu0  ;;  %v1112_v26 = vmul.f32 %v2709_v16, %v4300_v14 }
 0x138   : > { %v867_v27 = vadd.f32 %v2470_v22, %v3278_v11  ;;  %v858_v23 = vpop.f32.mrb[21].mxu0  ;;  %v1110_v29 = vmul.f32 %v2711_v21, %v2600_v18 }
 0x139   : > { %v859_v32 = vadd.f32 %v3278_v11, %v858_v23  ;;  %v2471_v34 = vpop.f32.mrb[22].mxu0  ;;  %v1136_v37 = vpack.c.bf16 %v1112_v26, %v1111_v24 }
 0x13a   : > { %2720 = vtanh.f32 %v867_v27  ;;  %v870_v41 = vadd.f32 %v2471_v34, %v3278_v11  ;;  %v861_v46 = vpop.f32.mrb[23].mxu0  ;;  %v1135_v47 = vpack.c.bf16 %v1110_v29, %v1109_v28  ;;  %v4293_v34 = vunpack.i.h.bf16 %v3271_v9 }
 0x13b   : > { %2722 = vtanh.f32 %v859_v32  ;;  %v862_v48 = vadd.f32 %v3278_v11, %v861_v46  ;;  %v4295_v46 = vunpack.i.h.bf16 %v3273_v10 }
 0x13c   : > { %v2713_v49 = vpop.eup %2712  ;;  %2724 = vtanh.f32 %v870_v41  ;;  %2508 = vmatprep.mubr.bf16.mxu1 %v1135_v47  ;;  %v4292_v47 = vunpack.i.l.bf16 %v3273_v10 }
 0x13d   : > { %v2715_v50 = vpop.eup %2714  ;;  %2726 = vtanh.f32 %v862_v48  ;;  %2509 = vmatmul.mubr.bf16.gmra.mrb[8].mxu1 %v1136_v37  ;;  %v1115_v58 = vmul.f32 %v2713_v49, %v4294_v52  ;;  %v4290_v37 = vunpack.i.l.bf16 %v3271_v9 }
 0x13e   : > { %v2717_v53 = vpop.eup %2716  ;;  %v1113_v0 = vmul.f32 %v2715_v50, %v4296_v55 }
 0x13f   : > { %v2719_v56 = vpop.eup %2718  ;;  %v2474_v57 = vpop.f32.mrb[24].mxu0  ;;  %v1116_v31 = vmul.f32 %v2717_v53, %v4297_v51 }
 0x140   : > { %v883_v59 = vadd.f32 %v2474_v57, %v3278_v11  ;;  %v874_v61 = vpop.f32.mrb[25].mxu0  ;;  %v1114_v16 = vmul.f32 %v2719_v56, %v4299_v54 }
 0x141   : > { %v875_v21 = vadd.f32 %v3278_v11, %v874_v61  ;;  %v2475_v22 = vpop.f32.mrb[26].mxu0  ;;  %v1138_v24 = vpack.c.bf16 %v1116_v31, %v1115_v58 }
 0x142   : > { %2728 = vtanh.f32 %v883_v59  ;;  %v886_v26 = vadd.f32 %v2475_v22, %v3278_v11  ;;  %v877_v27 = vpop.f32.mrb[27].mxu0  ;;  %v1137_v23 = vpack.c.bf16 %v1114_v16, %v1113_v0 }
 0x143   : > { %2730 = vtanh.f32 %v875_v21  ;;  %v878_v28 = vadd.f32 %v3278_v11, %v877_v27 }
 0x144   : > { %v2721_v29 = vpop.eup %2720  ;;  %2732 = vtanh.f32 %v886_v26  ;;  %2512 = vmatprep.mubr.bf16.mxu1 %v1137_v23  ;;  %v4289_v23 = vunpack.i.h.bf16 %v3280_v12 }
 0x145   : > { %v2723_v32 = vpop.eup %2722  ;;  %2734 = vtanh.f32 %v878_v28  ;;  %2513 = vmatmul.mubr.bf16.gmra.mrb[12].mxu1 %v1138_v24  ;;  %v1119_v50 = vmul.f32 %v2721_v29, %v4290_v37  ;;  %v4286_v28 = vunpack.i.l.bf16 %v3280_v12 }
 0x146   : > { %v2725_v41 = vpop.eup %2724  ;;  %v1117_v58 = vmul.f32 %v2723_v32, %v4292_v47  ;;  %v4291_v32 = vunpack.i.h.bf16 %v3282_v13 }
 0x147   : > { %v2727_v48 = vpop.eup %2726  ;;  %v2478_v49 = vpop.f32.mrb[28].mxu0  ;;  %v1120_v53 = vmul.f32 %v2725_v41, %v4293_v34  ;;  %v4288_v41 = vunpack.i.l.bf16 %v3282_v13 }
 0x148   : > { %v899_v56 = vadd.f32 %v2478_v49, %v3278_v11  ;;  %v890_v57 = vpop.f32.mrb[29].mxu0  ;;  %v1118_v31 = vmul.f32 %v2727_v48, %v4295_v46 }
 0x149   : > { %v891_v59 = vadd.f32 %v3278_v11, %v890_v57  ;;  %v2479_v61 = vpop.f32.mrb[30].mxu0  ;;  %v1140_v0 = vpack.c.bf16 %v1120_v53, %v1119_v50 }
 0x14a   : > { %2736 = vtanh.f32 %v899_v56  ;;  %v902_v16 = vadd.f32 %v2479_v61, %v3278_v11  ;;  %v893_v21 = vpop.f32.mrb[31].mxu0  ;;  %v1139_v22 = vpack.c.bf16 %v1118_v31, %v1117_v58  ;;  %v4284_v61 = vunpack.i.l.bf16 %v3288_v25 }
 0x14b   : > { %2738 = vtanh.f32 %v891_v59  ;;  %v894_v24 = vadd.f32 %v3278_v11, %v893_v21  ;;  %v4283_v59 = vunpack.i.h.bf16 %v3288_v25  ;;  %v4285_v21 = vunpack.i.l.bf16 %v3290_v20 }
 0x14c   : > { %v2729_v26 = vpop.eup %2728  ;;  %2740 = vtanh.f32 %v902_v16  ;;  %2516 = vmatprep.mubr.bf16.mxu1 %v1139_v22  ;;  %v4287_v16 = vunpack.i.h.bf16 %v3290_v20 }
 0x14d   : > { %v2731_v27 = vpop.eup %2730  ;;  %2742 = vtanh.f32 %v894_v24  ;;  %2517 = vmatmul.mubr.bf16.gmra.mrb[16].mxu1 %v1140_v0  ;;  %v1123_v49 = vmul.f32 %v2729_v26, %v4286_v28 }
 0x14e   : > { %v2733_v29 = vpop.eup %2732  ;;  %v1121_v50 = vmul.f32 %v2731_v27, %v4288_v41 }
 0x14f   : > { %v2735_v48 = vpop.eup %2734  ;;  %v1124_v11 = vmul.f32 %v2733_v29, %v4289_v23 }
 0x150   : > { %v1122_v53 = vmul.f32 %v2735_v48, %v4291_v32 }
 0x151   : > { %v1142_v56 = vpack.c.bf16 %v1124_v11, %v1123_v49  ;;  %v3421_v11 = vand.u32 127, %v437_v17 }
 0x152   : > { %v1141_v57 = vpack.c.bf16 %v1122_v53, %v1121_v50  ;;  %v3426_v50 = vld [vmem:[%s4280_s5] ss:$0 sm:$0xff] }
 0x153   : > { %vm1379_vm4 = vcmp.lt.s32.totalorder %v3421_v11, 63  ;;  %v4327_v11 = vunpack.i.h.bf16 %v3267_v7 }
 0x154   : > { %v2737_v58 = vpop.eup %2736  ;;  %2520 = vmatprep.mubr.bf16.mxu1 %v1141_v57 }
 0x155   : > { %v2739_v31 = vpop.eup %2738  ;;  %2521 = vmatmul.mubr.bf16.gmra.mrb[20].mxu1 %v1142_v56  ;;  %v1127_v24 = vmul.f32 %v2737_v58, %v4284_v61 }
 0x156   : > { %v2741_v0 = vpop.eup %2740  ;;  %v1125_v27 = vmul.f32 %v2739_v31, %v4285_v21 }
 0x157   : > { %v2743_v22 = vpop.eup %2742  ;;  %v1128_v26 = vmul.f32 %v2741_v0, %v4283_v59 }
 0x158   : > { %v1126_v29 = vmul.f32 %v2743_v22, %v4287_v16 }
 0x159   : > { %v1144_v48 = vpack.c.bf16 %v1128_v26, %v1127_v24 }
 0x15a   : > { %v1143_v49 = vpack.c.bf16 %v1126_v29, %v1125_v27 }
 0x15c   : > { %2524 = vmatprep.mubr.bf16.mxu1 %v1143_v49 }
 0x15d   : > { %2525 = vmatmul.mubr.bf16.gmra.mrb[24].mxu1 %v1144_v48 }
 0x1f8   : > { %v2498_v53 = vpop.f32.mrb[32].mxu0 }
 0x1f9   : > { %v3430_v56 = vadd.f32 %v2498_v53, %v3426_v50  ;;  %v1250_v57 = vpop.f32.mrb[33].mxu0 }
 0x1fa   : > { %v3433_v58 = vadd.f32 %v3426_v50, %v1250_v57  ;;  %v2499_v31 = vpop.f32.mrb[34].mxu0 }
 0x1fb   : > { %v1253_v0 = vpop.f32.mrb[35].mxu0  ;;  %v1382_v17 = vsel %vm1379_vm4, %v3430_v56, -inf  ;;  %v3450_v53 = vadd.f32 %v2499_v31, %v3426_v50 }
 0x1fc   : > { %1416 = vmax.xlane.f32.xlu1 %v1382_v17  ;;  %v1380_v22 = vsel %vm1379_vm4, %v3433_v58, -inf  ;;  %v3459_v21 = vadd.f32 %v3426_v50, %v1253_v0 }
 0x1fd   : > { %1412 = vmax.xlane.f32.xlu0 %v1380_v22  ;;  %v1865_v31 = vmul.f32 %v2655_v39, %v3450_v53  ;;  %v1864_v39 = vmul.f32 %v2654_v40, %v3430_v56 }
 0x1fe   : > { %v1381_v35 = vsel %vm1379_vm4, %v3459_v21, -inf }
 0x200   : > { %v2502_v24 = vpop.f32.mrb[0].mxu1 }
 0x201   : > { %v3441_v26 = vpop.f32.mrb[1].mxu1  ;;  %v3528_v15 = vadd.f32 %v2502_v24, %v3426_v50 }
 0x202   : > { %v2503_v27 = vpop.f32.mrb[2].mxu1  ;;  %v3544_v24 = vadd.f32 %v3426_v50, %v3441_v26 }
 0x203   : > { %v3444_v29 = vadd.f32 %v2503_v27, %v3426_v50  ;;  %v1269_v48 = vpop.f32.mrb[3].mxu1  ;;  %v1386_v45 = vsel %vm1379_vm4, %v3528_v15, -inf }
 0x204   : > { %v3447_v49 = vadd.f32 %v3426_v50, %v1269_v48 }
 0x208   : > { %v2506_v57 = vpop.f32.mrb[4].mxu1 }
 0x209   : > { %v3453_v17 = vadd.f32 %v2506_v57, %v3426_v50  ;;  %v1282_v59 = vpop.f32.mrb[5].mxu1 }
 0x20a   : > { %v3456_v22 = vadd.f32 %v3426_v50, %v1282_v59  ;;  %v2507_v61 = vpop.f32.mrb[6].mxu1  ;;  %v1863_v59 = vmul.f32 %v2650_v42, %v3459_v21 }
 0x20b   : > { %v3462_v27 = vadd.f32 %v2507_v61, %v3426_v50  ;;  %v1285_v48 = vpop.f32.mrb[7].mxu1 }
 0x20c   : > { %v3468_v28 = vadd.f32 %v3426_v50, %v1285_v48 }
 0x20d   : > { %1932 = vrot.lane.b32.xlu1 %v1865_v31, %s2913_s15 }
 0x210   : > { %v2510_v0 = vpop.f32.mrb[8].mxu1 }
 0x211   : > { %v3475_v57 = vadd.f32 %v2510_v0, %v3426_v50  ;;  %v1298_v61 = vpop.f32.mrb[9].mxu1  ;;  %1928 = vrot.lane.b32.xlu1 %v1863_v59, %s2913_s15 }
 0x212   : > { %v3482_v48 = vadd.f32 %v3426_v50, %v1298_v61  ;;  %v2511_v16 = vpop.f32.mrb[10].mxu1 }
 0x213   : > { %v3485_v31 = vadd.f32 %v2511_v16, %v3426_v50  ;;  %v1301_v41 = vpop.f32.mrb[11].mxu1  ;;  %1930 = vrot.lane.b32.xlu0 %v1864_v39, %s2913_s15 }
 0x214   : > { %v3489_v42 = vadd.f32 %v3426_v50, %v1301_v41 }
 0x218   : > { %v2514_v0 = vpop.f32.mrb[12].mxu1 }
 0x219   : > { %v3492_v59 = vadd.f32 %v2514_v0, %v3426_v50  ;;  %v1314_v23 = vpop.f32.mrb[13].mxu1 }
 0x21a   : > { %v3495_v30 = vadd.f32 %v3426_v50, %v1314_v23  ;;  %v2515_v40 = vpop.f32.mrb[14].mxu1 }
 0x21b   : > { %v3498_v61 = vadd.f32 %v2515_v40, %v3426_v50  ;;  %v1317_v16 = vpop.f32.mrb[15].mxu1 }
 0x21c   : > { %v3501_v37 = vadd.f32 %v3426_v50, %v1317_v16 }
 0x220   : > { %v2518_v39 = vpop.f32.mrb[16].mxu1 }
 0x221   : > { %v3504_v41 = vadd.f32 %v2518_v39, %v3426_v50  ;;  %v1330_v32 = vpop.f32.mrb[17].mxu1 }
 0x222   : > { %v3507_v0 = vadd.f32 %v3426_v50, %v1330_v32  ;;  %v2519_v47 = vpop.f32.mrb[18].mxu1 }
 0x223   : > { %v3510_v23 = vadd.f32 %v2519_v47, %v3426_v50  ;;  %v1333_v34 = vpop.f32.mrb[19].mxu1 }
 0x224   : > { %v3513_v40 = vadd.f32 %v3426_v50, %v1333_v34 }
 0x225   : > { %v1403_v2 = vsel %vm1379_vm4, %v3510_v23, -inf }
 0x228   : > { %v2522_v52 = vpop.f32.mrb[20].mxu1 }
 0x229   : > { %v3516_v16 = vadd.f32 %v2522_v52, %v3426_v50  ;;  %v1346_v46 = vpop.f32.mrb[21].mxu1 }
 0x22a   : > { %v3519_v39 = vadd.f32 %v3426_v50, %v1346_v46  ;;  %v2523_v55 = vpop.f32.mrb[22].mxu1  ;;  %v1383_v46 = vsel %vm1379_vm4, %v3450_v53, -inf }
 0x22b   : > { %v3522_v32 = vadd.f32 %v2523_v55, %v3426_v50  ;;  %v1349_v51 = vpop.f32.mrb[23].mxu1 }
 0x22c   : > { %v3525_v47 = vadd.f32 %v3426_v50, %v1349_v51 }
 0x230   : > { %v2526_v34 = vpop.f32.mrb[24].mxu1 }
 0x231   : > { %v3531_v54 = vadd.f32 %v2526_v34, %v3426_v50  ;;  %v1362_v52 = vpop.f32.mrb[25].mxu1 }
 0x232   : > { %v3537_v14 = vadd.f32 %v3426_v50, %v1362_v52  ;;  %v2527_v55 = vpop.f32.mrb[26].mxu1  ;;  %1418 = vmax.xlane.f32.xlu0 %v1383_v46  ;;  %v1384_v52 = vsel %vm1379_vm4, %v3544_v24, -inf  ;;  %v1862_v46 = vmul.f32 %v2649_v43, %v3433_v58  ;;  %v1390_v43 = vsel %vm1379_vm4, %v3453_v17, -inf }
 0x233   : > { %v3540_v51 = vadd.f32 %v2527_v55, %v3426_v50  ;;  %v1365_v19 = vpop.f32.mrb[27].mxu1  ;;  %v1871_v55 = vmul.f32 %v2590_v44, %v3468_v28  ;;  %v1387_v44 = vsel %vm1379_vm4, %v3444_v29, -inf }
 0x234   : > { %v3547_v34 = vadd.f32 %v3426_v50, %v1365_v19  ;;  %v1869_v19 = vmul.f32 %v2584_v36, %v3444_v29  ;;  %v1388_v36 = vsel %vm1379_vm4, %v3456_v22, -inf  ;;  %v1873_v50 = vmul.f32 %v2595_v33, %v3462_v27 }
 0x235   : > { %1424 = vmax.xlane.f32.xlu1 %v1386_v45  ;;  %v1867_v45 = vmul.f32 %v2579_v62, %v3447_v49  ;;  %v1868_v62 = vmul.f32 %v2583_v60, %v3528_v15 }
 0x239   : > { %1420 = vmax.xlane.f32.xlu1 %v1384_v52 }
 0x248   : > { %1926 = vrot.lane.b32.xlu0 %v1862_v46, %s2913_s15  ;;  %v1394_v46 = vsel %vm1379_vm4, %v3475_v57, -inf }
 0x24a   : > { %1940 = vrot.lane.b32.xlu1 %v1869_v19, %s2913_s15  ;;  %v1866_v19 = vmul.f32 %v2578_v63, %v3544_v24 }
 0x24e   : > { %1936 = vrot.lane.b32.xlu1 %v1867_v45, %s2913_s15  ;;  %v1392_v45 = vsel %vm1379_vm4, %v3482_v48, -inf }
 0x267   : > { %1414 = vmax.xlane.f32.xlu0 %v1381_v35  ;;  %v1396_v35 = vsel %vm1379_vm4, %v3495_v30, -inf }
 0x272   : > { %1432 = vmax.xlane.f32.xlu1 %v1390_v43  ;;  %v1399_v43 = vsel %vm1379_vm4, %v3498_v61, -inf }
 0x276   : > { %1428 = vmax.xlane.f32.xlu1 %v1388_v36 }
 0x27d   : > { %1938 = vrot.lane.b32.xlu0 %v1868_v62, %s2913_s15  ;;  %v1401_v62 = vsel %vm1379_vm4, %v3513_v40, -inf }
 0x287   : > { %1948 = vrot.lane.b32.xlu1 %v1873_v50, %s2913_s15 }
 0x289   : > { %v1417_v26 = vpop.xlane.xlu1 %1416 }
 0x28a   : > { %v1413_v52 = vpop.xlane.xlu0 %1412 }
 0x28b   : > { %1944 = vrot.lane.b32.xlu1 %v1871_v55, %s2913_s15 }
 0x28d   : > { %v1933_v4 = vpop.permute.xlu1 %1932 }
 0x28e   : > { %2025 = vst.msk [vmem:[%s3590_s17 + $0x18] sm:$0xff] %vm691_vm1, %v1933_v4  ;;  %v1931_v60 = vpop.permute.xlu0 %1930  ;;  %v1407_v4 = vsel %vm1379_vm4, %v3522_v32, -inf }
 0x28f   : > { %2024 = vst.msk [vmem:[%s3590_s17 + $0x10] sm:$0xff] %vm691_vm1, %v1931_v60 }
 0x291   : > { %v1929_v33 = vpop.permute.xlu1 %1928 }
 0x292   : > { %2023 = vst.msk [vmem:[%s3590_s17 + $0x8] sm:$0xff] %vm691_vm1, %v1929_v33  ;;  %v1405_v33 = vsel %vm1379_vm4, %v3525_v47, -inf }
 0x29c   : > { %1426 = vmax.xlane.f32.xlu0 %v1387_v44 }
 0x2af   : > { %1440 = vmax.xlane.f32.xlu1 %v1394_v46  ;;  %v1411_v46 = vsel %vm1379_vm4, %v3540_v51, -inf }
 0x2b2   : > { %1934 = vrot.lane.b32.xlu0 %v1866_v19, %s2913_s15  ;;  %v1385_v19 = vsel %vm1379_vm4, %v3447_v49, -inf }
 0x2b3   : > { %1436 = vmax.xlane.f32.xlu1 %v1392_v45  ;;  %v1409_v45 = vsel %vm1379_vm4, %v3547_v34, -inf }
 0x2b7   : > { %1444 = vmax.xlane.f32.xlu1 %v1396_v35  ;;  %v1875_v35 = vmul.f32 %v2600_v18, %v3489_v42 }
 0x2bb   : > { %1450 = vmax.xlane.f32.xlu1 %v1399_v43  ;;  %v1872_v43 = vmul.f32 %v2594_v38, %v3453_v17 }
 0x2bf   : > { %1458 = vmax.xlane.f32.xlu1 %v1403_v2  ;;  %v3620_v63 = vpop.xlane.xlu0 %1418  ;;  %v3655_v2 = vsub.f32 %v3430_v56, %v1417_v26 }
 0x2c2   : > { %v1425_v36 = vpop.xlane.xlu1 %1424 }
 0x2c3   : > { %1454 = vmax.xlane.f32.xlu1 %v1401_v62  ;;  %v1927_v50 = vpop.permute.xlu0 %1926  ;;  %v3667_v3 = vsub.f32 %v3528_v15, %v1425_v36  ;;  %v1391_v15 = vsel %vm1379_vm4, %v3462_v27, -inf }
 0x2c4   : > { %2022 = vst.msk [vmem:[%s3590_s17] sm:$0xff] %vm691_vm1, %v1927_v50  ;;  %v1512_v50 = vmul.f32 1.442695, %v3655_v2 }
 0x2c5   : > { %v1520_v38 = vmul.f32 1.442695, %v3667_v3 }
 0x2c6   : > { %v1421_v55 = vpop.xlane.xlu1 %1420  ;;  %2744 = vpow2.f32 %v1512_v50 }
 0x2c7   : > { %1466 = vmax.xlane.f32.xlu1 %v1407_v4  ;;  %v3661_v4 = vsub.f32 %v3433_v58, %v1413_v52  ;;  %v3671_v56 = vsub.f32 %v3544_v24, %v1421_v55 }
 0x2c9   : > { %v1508_v18 = vmul.f32 1.442695, %v3661_v4  ;;  %v1516_v58 = vmul.f32 1.442695, %v3671_v56 }
 0x2ca   : > { %v1941_v60 = vpop.permute.xlu1 %1940 }
 0x2cb   : > { %2029 = vst.msk [vmem:[%s3590_s17 + $0x38] sm:$0xff] %vm691_vm1, %v1941_v60  ;;  %1462 = vmax.xlane.f32.xlu1 %v1405_v33  ;;  %2746 = vpow2.f32 %v1508_v18 }
 0x2cc   : > { %2748 = vpow2.f32 %v1520_v38 }
 0x2cd   : > { %2750 = vpow2.f32 %v1516_v58 }
 0x2ce   : > { %v1937_v44 = vpop.permute.xlu1 %1936 }
 0x2cf   : > { %2027 = vst.msk [vmem:[%s3590_s17 + $0x28] sm:$0xff] %vm691_vm1, %v1937_v44  ;;  %1474 = vmax.xlane.f32.xlu1 %v1411_v46 }
 0x2d0   : > { %v2745_v44 = vpop.eup %2744 }
 0x2d1   : > { %1422 = vmax.xlane.f32.xlu0 %v1385_v19  ;;  %v1574_v46 = vsel %vm1379_vm4, %v2745_v44, 0.0 }
 0x2d3   : > { %1470 = vmax.xlane.f32.xlu1 %v1409_v45 }
 0x2e4   : > { %1952 = vrot.lane.b32.xlu1 %v1875_v35, %s2913_s15 }
 0x2e7   : > { %1946 = vrot.lane.b32.xlu0 %v1872_v43, %s2913_s15 }
 0x2f4   : > { %v3657_v62 = vpop.xlane.xlu0 %1414 }
 0x2f8   : > { %v1939_v60 = vpop.permute.xlu0 %1938 }
 0x2f9   : > { %2028 = vst.msk [vmem:[%s3590_s17 + $0x30] sm:$0xff] %vm691_vm1, %v1939_v60 }
 0x2ff   : > { %v1433_v26 = vpop.xlane.xlu1 %1432 }
 0x300   : > { %v3675_v52 = vsub.f32 %v3453_v17, %v1433_v26  ;;  %v2747_v17 = vpop.eup %2746 }
 0x301   : > { %v1572_v35 = vsel %vm1379_vm4, %v2747_v17, 0.0  ;;  %v2749_v43 = vpop.eup %2748 }
 0x302   : > { %4313 = vst [vmem:[#allocation7_spill] sm:$0xff] %v3675_v52  ;;  %v1528_v36 = vmul.f32 1.442695, %v3675_v52  ;;  %v1578_v50 = vsel %vm1379_vm4, %v2749_v43, 0.0  ;;  %v2751_v60 = vpop.eup %2750  ;;  %v1393_v43 = vsel %vm1379_vm4, %v3489_v42, -inf }
 0x303   : > { %v1429_v33 = vpop.xlane.xlu1 %1428  ;;  %v1576_v18 = vsel %vm1379_vm4, %v2751_v60, 0.0 }
 0x304   : > { %v3682_v24 = vsub.f32 %v3456_v22, %v1429_v33  ;;  %2752 = vpow2.f32 %v1528_v36  ;;  %v4315_v33 = vunpack.i.l.bf16 %v3255_v1  ;;  %v1395_v1 = vsel %vm1379_vm4, %v3485_v31, -inf }
 0x306   : > { %4314 = vst [vmem:[#allocation8_spill] sm:$0xff] %v3682_v24  ;;  %1434 = vmax.xlane.f32.xlu0 %v1391_v15  ;;  %v1524_v19 = vmul.f32 1.442695, %v3682_v24  ;;  %v1870_v44 = vmul.f32 %v4315_v33, %v3456_v22 }
 0x307   : > { %v1949_v55 = vpop.permute.xlu1 %1948 }
 0x308   : > { %2033 = vst.msk [vmem:[%s3590_s17 + $0x58] sm:$0xff] %vm691_vm1, %v1949_v55  ;;  %1608 = vadd.xlane.f32.xlu1 %v1574_v46  ;;  %2754 = vpow2.f32 %v1524_v19  ;;  %v1389_v46 = vsel %vm1379_vm4, %v3468_v28, -inf }
 0x30b   : > { %v1945_v45 = vpop.permute.xlu1 %1944 }
 0x30c   : > { %2031 = vst.msk [vmem:[%s3590_s17 + $0x48] sm:$0xff] %vm691_vm1, %v1945_v45  ;;  %1604 = vadd.xlane.f32.xlu1 %v1572_v35 }
 0x30e   : > { %v2753_v38 = vpop.eup %2752 }
 0x30f   : > { %v1582_v26 = vsel %vm1379_vm4, %v2753_v38, 0.0 }
 0x310   : > { %1616 = vadd.xlane.f32.xlu1 %v1578_v50 }
 0x312   : > { %v2755_v58 = vpop.eup %2754 }
 0x313   : > { %v1580_v15 = vsel %vm1379_vm4, %v2755_v58, 0.0 }
 0x314   : > { %1612 = vadd.xlane.f32.xlu1 %v1576_v18  ;;  %v1398_v18 = vsel %vm1379_vm4, %v3492_v59, -inf }
 0x318   : > { %1624 = vadd.xlane.f32.xlu1 %v1582_v26  ;;  %v1397_v26 = vsel %vm1379_vm4, %v3501_v37, -inf }
 0x31c   : > { %1942 = vrot.lane.b32.xlu0 %v1870_v44, %s2913_s15  ;;  %1620 = vadd.xlane.f32.xlu1 %v1580_v15  ;;  %v1402_v15 = vsel %vm1379_vm4, %v3504_v41, -inf }
 0x329   : > { %v1427_v36 = vpop.xlane.xlu0 %1426 }
 0x32d   : > { %v1935_v55 = vpop.permute.xlu0 %1934 }
 0x32e   : > { %2026 = vst.msk [vmem:[%s3590_s17 + $0x20] sm:$0xff] %vm691_vm1, %v1935_v55 }
 0x33b   : > { %1430 = vmax.xlane.f32.xlu0 %v1389_v46 }
 0x33c   : > { %v1441_v17 = vpop.xlane.xlu1 %1440 }
 0x33d   : > { %v3711_v19 = vsub.f32 %v3475_v57, %v1441_v17 }
 0x33f   : > { %4316 = vst [vmem:[#allocation9_spill] sm:$0xff] %v3711_v19  ;;  %v1536_v22 = vmul.f32 1.442695, %v3711_v19  ;;  %1442 = vmax.xlane.f32.xlu0 %v1395_v1  ;;  %v1400_v1 = vsel %vm1379_vm4, %v3507_v0, -inf }
 0x340   : > { %v1437_v45 = vpop.xlane.xlu1 %1436 }
 0x341   : > { %2756 = vpow2.f32 %v1536_v22  ;;  %v3718_v35 = vsub.f32 %v3482_v48, %v1437_v45  ;;  %v1406_v45 = vsel %vm1379_vm4, %v3516_v16, -inf }
 0x343   : > { %4317 = vst [vmem:[#allocation10_spill] sm:$0xff] %v3718_v35  ;;  %v1532_v50 = vmul.f32 1.442695, %v3718_v35  ;;  %1438 = vmax.xlane.f32.xlu0 %v1393_v43  ;;  %v3783_v35 = vsub.f32 %v3459_v21, %v3657_v62 }
 0x344   : > { %v3724_v60 = vpop.xlane.xlu1 %1444 }
 0x345   : > { %2758 = vpow2.f32 %v1532_v50  ;;  %v1404_v50 = vsel %vm1379_vm4, %v3519_v39, -inf }
 0x347   : > { %1448 = vmax.xlane.f32.xlu0 %v1398_v18 }
 0x348   : > { %v3729_v38 = vpop.xlane.xlu1 %1450 }
 0x34b   : > { %v2757_v58 = vpop.eup %2756  ;;  %1446 = vmax.xlane.f32.xlu0 %v1397_v26 }
 0x34c   : > { %v3734_v33 = vpop.xlane.xlu1 %1458  ;;  %v1586_v44 = vsel %vm1379_vm4, %v2757_v58, 0.0  ;;  %v1410_v58 = vsel %vm1379_vm4, %v3531_v54, -inf }
 0x34d   : > { %1632 = vadd.xlane.f32.xlu1 %v1586_v44 }
 0x34f   : > { %v2759_v55 = vpop.eup %2758  ;;  %1456 = vmax.xlane.f32.xlu0 %v1402_v15 }
 0x350   : > { %v3741_v46 = vpop.xlane.xlu1 %1454  ;;  %v1584_v17 = vsel %vm1379_vm4, %v2759_v55, 0.0  ;;  %v1408_v55 = vsel %vm1379_vm4, %v3537_v14, -inf }
 0x351   : > { %1628 = vadd.xlane.f32.xlu1 %v1584_v17 }
 0x353   : > { %1452 = vmax.xlane.f32.xlu0 %v1400_v1  ;;  %v4318_v1 = vunpack.i.l.bf16 %v3265_v6 }
 0x354   : > { %v3748_v22 = vpop.xlane.xlu1 %1466 }
 0x357   : > { %1464 = vmax.xlane.f32.xlu0 %v1406_v45  ;;  %v1874_v45 = vmul.f32 %v4318_v1, %v3482_v48 }
 0x358   : > { %v3753_v43 = vpop.xlane.xlu1 %1462 }
 0x35b   : > { %1460 = vmax.xlane.f32.xlu0 %v1404_v50  ;;  %v3778_v50 = vsub.f32 %v3450_v53, %v3620_v63 }
 0x35c   : > { %v3758_v18 = vpop.xlane.xlu1 %1474 }
 0x35d   : > { %v3883_v19 = vsub.f32 %v3540_v51, %v3758_v18 }
 0x35e   : > { %v1423_v26 = vpop.xlane.xlu0 %1422 }
 0x35f   : > { %1472 = vmax.xlane.f32.xlu0 %v1410_v58  ;;  %v1514_v58 = vmul.f32 1.442695, %v3778_v50  ;;  %v3791_v48 = vsub.f32 %v3447_v49, %v1423_v26  ;;  %v1570_v18 = vmul.f32 1.442695, %v3883_v19 }
 0x360   : > { %v3763_v44 = vpop.xlane.xlu1 %1470 }
 0x361   : > { %2760 = vpow2.f32 %v1514_v58  ;;  %4319 = vst [vmem:[#allocation11_spill] sm:$0xff] %v3791_v48  ;;  %v1518_v53 = vmul.f32 1.442695, %v3791_v48 }
 0x362   : > { %v1947_v15 = vpop.permute.xlu0 %1946 }
 0x363   : > { %2032 = vst.msk [vmem:[%s3590_s17 + $0x50] sm:$0xff] %vm691_vm1, %v1947_v15  ;;  %1468 = vmax.xlane.f32.xlu0 %v1408_v55  ;;  %v1510_v15 = vmul.f32 1.442695, %v3783_v35  ;;  %v3787_v55 = vsub.f32 %v3444_v29, %v1427_v36 }
 0x364   : > { %v1953_v17 = vpop.permute.xlu1 %1952 }
 0x365   : > { %2035 = vst.msk [vmem:[%s3590_s17 + $0x68] sm:$0xff] %vm691_vm1, %v1953_v17  ;;  %2762 = vpow2.f32 %v1510_v15  ;;  %v1522_v6 = vmul.f32 1.442695, %v3787_v55 }
 0x367   : > { %2764 = vpow2.f32 %v1522_v6 }
 0x368   : > { %2766 = vpow2.f32 %v1518_v53 }
 0x36b   : > { %v2761_v17 = vpop.eup %2760 }
 0x36c   : > { %v1575_v29 = vsel %vm1379_vm4, %v2761_v17, 0.0 }
 0x36f   : > { %v2763_v36 = vpop.eup %2762 }
 0x370   : > { %v1573_v49 = vsel %vm1379_vm4, %v2763_v36, 0.0 }
 0x371   : > { %v2765_v26 = vpop.eup %2764 }
 0x379   : > { %1950 = vrot.lane.b32.xlu0 %v1874_v45, %s2913_s15  ;;  %v2767_v45 = vpop.eup %2766 }
 0x37a   : > { %v1577_v58 = vsel %vm1379_vm4, %v2767_v45, 0.0 }
 0x393   : > { %v1435_v63 = vpop.xlane.xlu0 %1434 }
 0x394   : > { %v3795_v21 = vsub.f32 %v3462_v27, %v1435_v63  ;;  %v1579_v27 = vsel %vm1379_vm4, %v2765_v26, 0.0 }
 0x396   : > { %4320 = vst [vmem:[#allocation12_spill] sm:$0xff] %v3795_v21  ;;  %v1530_v62 = vmul.f32 1.442695, %v3795_v21 }
 0x397   : > { %v1943_v1 = vpop.permute.xlu0 %1942 }
 0x398   : > { %2030 = vst.msk [vmem:[%s3590_s17 + $0x40] sm:$0xff] %vm691_vm1, %v1943_v1  ;;  %1610 = vadd.xlane.f32.xlu0 %v1575_v29  ;;  %2768 = vpow2.f32 %v1530_v62  ;;  %v3819_v29 = vsub.f32 %v3498_v61, %v3729_v38 }
 0x39c   : > { %1606 = vadd.xlane.f32.xlu0 %v1573_v49 }
 0x3a0   : > { %1618 = vadd.xlane.f32.xlu0 %v1579_v27  ;;  %v1546_v27 = vmul.f32 1.442695, %v3819_v29 }
 0x3a2   : > { %v2769_v15 = vpop.eup %2768 }
 0x3a3   : > { %v1583_v6 = vsel %vm1379_vm4, %v2769_v15, 0.0 }
 0x3a4   : > { %1614 = vadd.xlane.f32.xlu0 %v1577_v58 }
 0x3a8   : > { %1626 = vadd.xlane.f32.xlu0 %v1583_v6 }
 0x3c8   : > { %v1431_v53 = vpop.xlane.xlu0 %1430 }
 0x3c9   : > { %v3811_v63 = vsub.f32 %v3468_v28, %v1431_v53  ;;  %v3827_v28 = vsub.f32 %v3495_v30, %v3724_v60 }
 0x3cb   : > { %4321 = vst [vmem:[#allocation13_spill] sm:$0xff] %v3811_v63  ;;  %v1526_v17 = vmul.f32 1.442695, %v3811_v63  ;;  %v1540_v6 = vmul.f32 1.442695, %v3827_v28 }
 0x3cc   : > { %v1443_v62 = vpop.xlane.xlu0 %1442 }
 0x3cd   : > { %2770 = vpow2.f32 %v1526_v17  ;;  %v3815_v1 = vsub.f32 %v3485_v31, %v1443_v62 }
 0x3cf   : > { %4322 = vst [vmem:[#allocation14_spill] sm:$0xff] %v3815_v1  ;;  %v1538_v36 = vmul.f32 1.442695, %v3815_v1 }
 0x3d0   : > { %v1439_v49 = vpop.xlane.xlu0 %1438 }
 0x3d1   : > { %2772 = vpow2.f32 %v1538_v36  ;;  %v3823_v26 = vsub.f32 %v3489_v42, %v1439_v49  ;;  %v3837_v42 = vsub.f32 %v3510_v23, %v3734_v33 }
 0x3d3   : > { %4323 = vst [vmem:[#allocation15_spill] sm:$0xff] %v3823_v26  ;;  %v1534_v45 = vmul.f32 1.442695, %v3823_v26  ;;  %v1554_v49 = vmul.f32 1.442695, %v3837_v42 }
 0x3d4   : > { %v1449_v58 = vpop.xlane.xlu0 %1448 }
 0x3d5   : > { %2774 = vpow2.f32 %v1534_v45  ;;  %v3832_v38 = vsub.f32 %v3492_v59, %v1449_v58 }
 0x3d6   : > { %2776 = vpow2.f32 %v1546_v27  ;;  %v3848_v27 = vsub.f32 %v3513_v40, %v3741_v46 }
 0x3d7   : > { %v2771_v15 = vpop.eup %2770  ;;  %v1544_v60 = vmul.f32 1.442695, %v3832_v38 }
 0x3d8   : > { %v1447_v53 = vpop.xlane.xlu0 %1446  ;;  %v1581_v17 = vsel %vm1379_vm4, %v2771_v15, 0.0 }
 0x3d9   : > { %2778 = vpow2.f32 %v1544_v60  ;;  %v3843_v62 = vsub.f32 %v3501_v37, %v1447_v53  ;;  %1622 = vadd.xlane.f32.xlu0 %v1581_v17  ;;  %v3859_v53 = vsub.f32 %v3522_v32, %v3748_v22  ;;  %v3870_v22 = vsub.f32 %v3525_v47, %v3753_v43 }
 0x3da   : > { %2780 = vpow2.f32 %v1540_v6  ;;  %v1550_v6 = vmul.f32 1.442695, %v3848_v27 }
 0x3db   : > { %v2773_v36 = vpop.eup %2772  ;;  %v1542_v33 = vmul.f32 1.442695, %v3843_v62  ;;  %v1558_v43 = vmul.f32 1.442695, %v3870_v22 }
 0x3dc   : > { %v1457_v45 = vpop.xlane.xlu0 %1456  ;;  %v1587_v58 = vsel %vm1379_vm4, %v2773_v36, 0.0 }
 0x3dd   : > { %2782 = vpow2.f32 %v1542_v33  ;;  %v3854_v15 = vsub.f32 %v3504_v41, %v1457_v45  ;;  %1634 = vadd.xlane.f32.xlu0 %v1587_v58 }
 0x3de   : > { %2784 = vpow2.f32 %v1554_v49  ;;  %v1562_v49 = vmul.f32 1.442695, %v3859_v53 }
 0x3df   : > { %v2775_v60 = vpop.eup %2774  ;;  %v1552_v46 = vmul.f32 1.442695, %v3854_v15 }
 0x3e0   : > { %v1453_v17 = vpop.xlane.xlu0 %1452  ;;  %v1585_v26 = vsel %vm1379_vm4, %v2775_v60, 0.0  ;;  %v2777_v36 = vpop.eup %2776 }
 0x3e1   : > { %2786 = vpow2.f32 %v1552_v46  ;;  %v3865_v33 = vsub.f32 %v3507_v0, %v1453_v17  ;;  %1630 = vadd.xlane.f32.xlu0 %v1585_v26  ;;  %v1591_v60 = vsel %vm1379_vm4, %v2777_v36, 0.0 }
 0x3e2   : > { %2788 = vpow2.f32 %v1550_v6 }
 0x3e3   : > { %v2779_v45 = vpop.eup %2778  ;;  %v1548_v58 = vmul.f32 1.442695, %v3865_v33 }
 0x3e4   : > { %v1465_v1 = vpop.xlane.xlu0 %1464  ;;  %v1590_v46 = vsel %vm1379_vm4, %v2779_v45, 0.0  ;;  %v2781_v17 = vpop.eup %2780 }
 0x3e5   : > { %2790 = vpow2.f32 %v1548_v58  ;;  %v3878_v26 = vsub.f32 %v3516_v16, %v1465_v1  ;;  %1642 = vadd.xlane.f32.xlu0 %v1591_v60  ;;  %1640 = vadd.xlane.f32.xlu1 %v1590_v46  ;;  %v1588_v45 = vsel %vm1379_vm4, %v2781_v17, 0.0  ;;  %v3896_v46 = vsub.f32 %v3547_v34, %v3763_v44 }
 0x3e6   : > { %2792 = vpow2.f32 %v1562_v49 }
 0x3e7   : > { %v2783_v6 = vpop.eup %2782  ;;  %v1560_v36 = vmul.f32 1.442695, %v3878_v26  ;;  %v1566_v44 = vmul.f32 1.442695, %v3896_v46 }
 0x3e8   : > { %v1461_v63 = vpop.xlane.xlu0 %1460  ;;  %v1589_v1 = vsel %vm1379_vm4, %v2783_v6, 0.0  ;;  %v2785_v58 = vpop.eup %2784 }
 0x3e9   : > { %2794 = vpow2.f32 %v1560_v36  ;;  %v3891_v60 = vsub.f32 %v3519_v39, %v1461_v63  ;;  %1636 = vadd.xlane.f32.xlu1 %v1588_v45  ;;  %1638 = vadd.xlane.f32.xlu0 %v1589_v1  ;;  %v1595_v6 = vsel %vm1379_vm4, %v2785_v58, 0.0 }
 0x3ea   : > { %2796 = vpow2.f32 %v1558_v43 }
 0x3eb   : > { %v2787_v49 = vpop.eup %2786  ;;  %v1556_v17 = vmul.f32 1.442695, %v3891_v60 }
 0x3ec   : > { %v1473_v24 = vpop.xlane.xlu0 %1472  ;;  %v1594_v63 = vsel %vm1379_vm4, %v2787_v49, 0.0  ;;  %v2789_v36 = vpop.eup %2788 }
 0x3ed   : > { %2798 = vpow2.f32 %v1556_v17  ;;  %v3904_v45 = vsub.f32 %v3531_v54, %v1473_v24  ;;  %1650 = vadd.xlane.f32.xlu0 %v1595_v6  ;;  %1648 = vadd.xlane.f32.xlu1 %v1594_v63  ;;  %v1593_v58 = vsel %vm1379_vm4, %v2789_v36, 0.0 }
 0x3ee   : > { %2800 = vpow2.f32 %v1570_v18 }
 0x3ef   : > { %v2791_v43 = vpop.eup %2790  ;;  %v1568_v1 = vmul.f32 1.442695, %v3904_v45 }
 0x3f0   : > { %v1469_v21 = vpop.xlane.xlu0 %1468  ;;  %v1592_v49 = vsel %vm1379_vm4, %v2791_v43, 0.0  ;;  %v2793_v17 = vpop.eup %2792 }
 0x3f1   : > { %2802 = vpow2.f32 %v1568_v1  ;;  %v3913_v24 = vsub.f32 %v3537_v14, %v1469_v21  ;;  %1646 = vadd.xlane.f32.xlu0 %v1593_v58  ;;  %1644 = vadd.xlane.f32.xlu1 %v1592_v49  ;;  %v1599_v52 = vsel %vm1379_vm4, %v2793_v17, 0.0 }
 0x3f2   : > { %2804 = vpow2.f32 %v1566_v44 }
 0x3f3   : > { %v2795_v18 = vpop.eup %2794  ;;  %v1564_v6 = vmul.f32 1.442695, %v3913_v24 }
 0x3f4   : > { %v1951_v63 = vpop.permute.xlu0 %1950  ;;  %v1598_v36 = vsel %vm1379_vm4, %v2795_v18, 0.0  ;;  %v2797_v48 = vpop.eup %2796 }
 0x3f5   : > { %2806 = vpow2.f32 %v1564_v6  ;;  %2034 = vst.msk [vmem:[%s3590_s17 + $0x60] sm:$0xff] %vm691_vm1, %v1951_v63  ;;  %1658 = vadd.xlane.f32.xlu0 %v1599_v52  ;;  %1656 = vadd.xlane.f32.xlu1 %v1598_v36  ;;  %v1597_v43 = vsel %vm1379_vm4, %v2797_v48, 0.0  ;;  %v4324_v63 = vunpack.i.h.bf16 %v3263_v5 }
 0x3f7   : > { %v2799_v21 = vpop.eup %2798  ;;  %v1877_v36 = vmul.f32 %v4324_v63, %v3485_v31  ;;  %v4328_v31 = vunpack.i.l.bf16 %v3269_v8 }
 0x3f8   : > { %v1596_v44 = vsel %vm1379_vm4, %v2799_v21, 0.0  ;;  %v2801_v1 = vpop.eup %2800  ;;  %v4325_v21 = vunpack.i.h.bf16 %v3269_v8  ;;  %v4331_v8 = vunpack.i.h.bf16 %v3271_v9 }
 0x3f9   : > { %1654 = vadd.xlane.f32.xlu0 %v1597_v43  ;;  %1652 = vadd.xlane.f32.xlu1 %v1596_v44  ;;  %v1603_v49 = vsel %vm1379_vm4, %v2801_v1, 0.0  ;;  %v4326_v44 = vunpack.i.l.bf16 %v3263_v5  ;;  %v4329_v5 = vunpack.i.h.bf16 %v3273_v10 }
 0x3fa   : > { %v1879_v43 = vmul.f32 %v4325_v21, %v3501_v37 }
 0x3fb   : > { %v2803_v58 = vpop.eup %2802  ;;  %v1876_v1 = vmul.f32 %v4326_v44, %v3475_v57  ;;  %v1883_v37 = vmul.f32 %v4329_v5, %v3513_v40  ;;  %v4330_v57 = vunpack.i.l.bf16 %v3267_v7  ;;  %v4333_v7 = vunpack.i.h.bf16 %v3282_v13 }
 0x3fc   : > { %v1602_v17 = vsel %vm1379_vm4, %v2803_v58, 0.0  ;;  %v2805_v18 = vpop.eup %2804  ;;  %v1881_v58 = vmul.f32 %v4327_v11, %v3498_v61  ;;  %v4332_v61 = vunpack.i.l.bf16 %v3273_v10  ;;  %v4334_v40 = vunpack.i.l.bf16 %v3271_v9 }
 0x3fd   : > { %1666 = vadd.xlane.f32.xlu0 %v1603_v49  ;;  %1664 = vadd.xlane.f32.xlu1 %v1602_v17  ;;  %v1601_v48 = vsel %vm1379_vm4, %v2805_v18, 0.0  ;;  %v1878_v49 = vmul.f32 %v4328_v31, %v3495_v30  ;;  %v1880_v17 = vmul.f32 %v4330_v57, %v3492_v59  ;;  %v1885_v30 = vmul.f32 %v4331_v8, %v3510_v23 }
 0x3fe   : > { %v1882_v18 = vmul.f32 %v4332_v61, %v3507_v0  ;;  %v1887_v59 = vmul.f32 %v4333_v7, %v3525_v47  ;;  %v4335_v10 = vunpack.i.h.bf16 %v3280_v12  ;;  %v4336_v23 = vunpack.i.l.bf16 %v3282_v13 }
 0x3ff   : > { %v2807_v52 = vpop.eup %2806  ;;  %v4337_v9 = vunpack.i.h.bf16 %v3290_v20  ;;  %v4338_v47 = vunpack.i.l.bf16 %v3280_v12  ;;  %v4339_v13 = vunpack.i.l.bf16 %v3290_v20 }
 0x400   : > { %v1600_v6 = vsel %vm1379_vm4, %v2807_v52, 0.0  ;;  %v1884_v52 = vmul.f32 %v4334_v40, %v3504_v41  ;;  %v1889_v0 = vmul.f32 %v4335_v10, %v3522_v32  ;;  %v3998_v32 = vpop.xlane.xlu1 %1608 }
 0x401   : > { %1662 = vadd.xlane.f32.xlu0 %v1601_v48  ;;  %1660 = vadd.xlane.f32.xlu1 %v1600_v6  ;;  %v1886_v48 = vmul.f32 %v4336_v23, %v3519_v39  ;;  %v1891_v41 = vmul.f32 %v4337_v9, %v3547_v34  ;;  %v1888_v6 = vmul.f32 %v4338_v47, %v3516_v16 }
 0x402   : > { %v1890_v39 = vmul.f32 %v4339_v13, %v3537_v14 }
 0x412   : > { %1956 = vrot.lane.b32.xlu1 %v1877_v36, %s2913_s15  ;;  %v4002_v36 = vpop.xlane.xlu1 %1604 }
 0x416   : > { %1960 = vrot.lane.b32.xlu1 %v1879_v43, %s2913_s15  ;;  %v4006_v12 = vpop.xlane.xlu1 %1616 }
 0x417   : > { %1954 = vrot.lane.b32.xlu0 %v1876_v1, %s2913_s15 }
 0x41a   : > { %1964 = vrot.lane.b32.xlu1 %v1881_v58, %s2913_s15  ;;  %v4010_v21 = vpop.xlane.xlu1 %1612 }
 0x41b   : > { %1958 = vrot.lane.b32.xlu0 %v1878_v49, %s2913_s15 }
 0x41e   : > { %1968 = vrot.lane.b32.xlu1 %v1883_v37, %s2913_s15  ;;  %v4014_v20 = vpop.xlane.xlu1 %1624 }
 0x41f   : > { %1962 = vrot.lane.b32.xlu0 %v1880_v17, %s2913_s15 }
 0x422   : > { %1972 = vrot.lane.b32.xlu1 %v1885_v30, %s2913_s15  ;;  %v4018_v44 = vpop.xlane.xlu1 %1620 }
 0x423   : > { %1966 = vrot.lane.b32.xlu0 %v1882_v18, %s2913_s15 }
 0x425   : > { %v4000_v63 = vpop.xlane.xlu0 %1610 }
 0x426   : > { %1976 = vrot.lane.b32.xlu1 %v1887_v59, %s2913_s15  ;;  %v4022_v11 = vpop.xlane.xlu1 %1632 }
 0x427   : > { %1970 = vrot.lane.b32.xlu0 %v1884_v52, %s2913_s15 }
 0x429   : > { %v4004_v34 = vpop.xlane.xlu0 %1606 }
 0x42a   : > { %1980 = vrot.lane.b32.xlu1 %v1889_v0, %s2913_s15  ;;  %v4026_v31 = vpop.xlane.xlu1 %1628 }
 0x42b   : > { %1974 = vrot.lane.b32.xlu0 %v1886_v48, %s2913_s15 }
 0x42d   : > { %v4008_v16 = vpop.xlane.xlu0 %1618 }
 0x42e   : > { %1984 = vrot.lane.b32.xlu1 %v1891_v41, %s2913_s15 }
 0x42f   : > { %1978 = vrot.lane.b32.xlu0 %v1888_v6, %s2913_s15 }
 0x431   : > { %v4012_v43 = vpop.xlane.xlu0 %1614 }
 0x433   : > { %1982 = vrot.lane.b32.xlu0 %v1890_v39, %s2913_s15 }
 0x435   : > { %v4016_v14 = vpop.xlane.xlu0 %1626 }
 0x466   : > { %v4020_v1 = vpop.xlane.xlu0 %1622 }
 0x46a   : > { %v4024_v58 = vpop.xlane.xlu0 %1634 }
 0x46e   : > { %v4028_v49 = vpop.xlane.xlu0 %1630 }
 0x472   : > { %v1641_v5 = vpop.xlane.xlu1 %1640  ;;  %v1643_v37 = vpop.xlane.xlu0 %1642 }
 0x473   : > { %2808 = vlog2.f32 %v1641_v5 }
 0x474   : > { %2810 = vlog2.f32 %v1643_v37 }
 0x476   : > { %v1637_v57 = vpop.xlane.xlu1 %1636  ;;  %v1639_v17 = vpop.xlane.xlu0 %1638 }
 0x477   : > { %2812 = vlog2.f32 %v1637_v57 }
 0x478   : > { %2814 = vlog2.f32 %v1639_v17 }
 0x47a   : > { %v1649_v8 = vpop.xlane.xlu1 %1648  ;;  %v1651_v30 = vpop.xlane.xlu0 %1650 }
 0x47b   : > { %2816 = vlog2.f32 %v1649_v8 }
 0x47c   : > { %2818 = vlog2.f32 %v1651_v30 }
 0x47d   : > { %v2809_v61 = vpop.eup %2808 }
 0x47e   : > { %v1705_v18 = vmul.f32 0.6931472, %v2809_v61  ;;  %v1645_v7 = vpop.xlane.xlu1 %1644  ;;  %v1647_v59 = vpop.xlane.xlu0 %1646 }
 0x47f   : > { %2820 = vlog2.f32 %v1645_v7  ;;  %v2811_v40 = vpop.eup %2810 }
 0x480   : > { %v1750_v52 = vsub.f32 %v3832_v38, %v1705_v18  ;;  %2822 = vlog2.f32 %v1647_v59  ;;  %v1707_v47 = vmul.f32 0.6931472, %v2811_v40 }
 0x481   : > { %v2813_v10 = vpop.eup %2812 }
 0x482   : > { %v2815_v0 = vpop.eup %2814  ;;  %v1701_v23 = vmul.f32 0.6931472, %v2813_v10  ;;  %v1657_v48 = vpop.xlane.xlu1 %1656  ;;  %1784 = vrot.lane.b32.xlu1 %v1750_v52, %s2914_s29  ;;  %v1751_v17 = vsub.f32 %v3819_v29, %v1707_v47 }
 0x483   : > { %v1659_v9 = vpop.xlane.xlu0 %1658  ;;  %v1703_v41 = vmul.f32 0.6931472, %v2815_v0  ;;  %2824 = vlog2.f32 %v1657_v48 }
 0x484   : > { %v1748_v6 = vsub.f32 %v3827_v28, %v1701_v23  ;;  %2826 = vlog2.f32 %v1659_v9 }
 0x485   : > { %v2817_v13 = vpop.eup %2816  ;;  %v1749_v39 = vsub.f32 %v3843_v62, %v1703_v41 }
 0x486   : > { %v2819_v5 = vpop.eup %2818  ;;  %v1713_v38 = vmul.f32 0.6931472, %v2817_v13  ;;  %v1653_v37 = vpop.xlane.xlu1 %1652  ;;  %1780 = vrot.lane.b32.xlu1 %v1748_v6, %s2914_s29 }
 0x487   : > { %v1655_v57 = vpop.xlane.xlu0 %1654  ;;  %2828 = vlog2.f32 %v1653_v37  ;;  %1782 = vrot.lane.b32.xlu0 %v1749_v39, %s2914_s29  ;;  %v1715_v30 = vmul.f32 0.6931472, %v2819_v5 }
 0x488   : > { %v1754_v8 = vsub.f32 %v3854_v15, %v1713_v38  ;;  %2830 = vlog2.f32 %v1655_v57 }
 0x489   : > { %v2821_v28 = vpop.eup %2820  ;;  %v1755_v59 = vsub.f32 %v3837_v42, %v1715_v30 }
 0x48a   : > { %v2823_v61 = vpop.eup %2822  ;;  %v1709_v18 = vmul.f32 0.6931472, %v2821_v28  ;;  %v1665_v7 = vpop.xlane.xlu1 %1664  ;;  %1786 = vrot.lane.b32.xlu1 %v1751_v17, %s2914_s29 }
 0x48b   : > { %v1667_v62 = vpop.xlane.xlu0 %1666  ;;  %2832 = vlog2.f32 %v1665_v7  ;;  %1792 = vrot.lane.b32.xlu0 %v1754_v8, %s2914_s29  ;;  %v1711_v52 = vmul.f32 0.6931472, %v2823_v61 }
 0x48c   : > { %v1752_v40 = vsub.f32 %v3865_v33, %v1709_v18  ;;  %2834 = vlog2.f32 %v1667_v62 }
 0x48d   : > { %v2825_v29 = vpop.eup %2824  ;;  %v1753_v48 = vsub.f32 %v3848_v27, %v1711_v52 }
 0x48e   : > { %v2827_v15 = vpop.eup %2826  ;;  %v1721_v10 = vmul.f32 0.6931472, %v2825_v29  ;;  %v1661_v0 = vpop.xlane.xlu1 %1660  ;;  %1794 = vrot.lane.b32.xlu1 %v1755_v59, %s2914_s29 }
 0x48f   : > { %v1663_v23 = vpop.xlane.xlu0 %1662  ;;  %2836 = vlog2.f32 %v1661_v0  ;;  %1788 = vrot.lane.b32.xlu0 %v1752_v40, %s2914_s29  ;;  %v1723_v9 = vmul.f32 0.6931472, %v2827_v15 }
 0x490   : > { %v1758_v42 = vsub.f32 %v3878_v26, %v1721_v10  ;;  %2838 = vlog2.f32 %v1663_v23 }
 0x491   : > { %v2829_v33 = vpop.eup %2828  ;;  %v1759_v27 = vsub.f32 %v3859_v53, %v1723_v9  ;;  %2840 = vlog2.f32 %v3998_v32 }
 0x492   : > { %v2831_v41 = vpop.eup %2830  ;;  %v1717_v47 = vmul.f32 0.6931472, %v2829_v33  ;;  %v1957_v6 = vpop.permute.xlu1 %1956  ;;  %1790 = vrot.lane.b32.xlu1 %v1753_v48, %s2914_s29  ;;  %2842 = vlog2.f32 %v4002_v36 }
 0x493   : > { %v1955_v13 = vpop.permute.xlu0 %1954  ;;  %2037 = vst.msk [vmem:[%s3590_s17 + $0x78] sm:$0xff] %vm691_vm1, %v1957_v6  ;;  %1800 = vrot.lane.b32.xlu0 %v1758_v42, %s2914_s29  ;;  %v1719_v39 = vmul.f32 0.6931472, %v2831_v41  ;;  %2844 = vlog2.f32 %v4004_v34 }
 0x494   : > { %2036 = vst.msk [vmem:[%s3590_s17 + $0x70] sm:$0xff] %vm691_vm1, %v1955_v13  ;;  %v1756_v26 = vsub.f32 %v3891_v60, %v1717_v47  ;;  %2846 = vlog2.f32 %v4000_v63 }
 0x495   : > { %v2833_v5 = vpop.eup %2832  ;;  %v1757_v53 = vsub.f32 %v3870_v22, %v1719_v39  ;;  %2848 = vlog2.f32 %v4006_v12 }
 0x496   : > { %v2835_v38 = vpop.eup %2834  ;;  %v1729_v37 = vmul.f32 0.6931472, %v2833_v5  ;;  %v1961_v57 = vpop.permute.xlu1 %1960  ;;  %1802 = vrot.lane.b32.xlu1 %v1759_v27, %s2914_s29  ;;  %2850 = vlog2.f32 %v4008_v16 }
 0x497   : > { %v1959_v17 = vpop.permute.xlu0 %1958  ;;  %2039 = vst.msk [vmem:[%s3590_s17 + $0x88] sm:$0xff] %vm691_vm1, %v1961_v57  ;;  %1796 = vrot.lane.b32.xlu0 %v1756_v26, %s2914_s29  ;;  %v1731_v8 = vmul.f32 0.6931472, %v2835_v38  ;;  %2852 = vlog2.f32 %v4010_v21 }
 0x498   : > { %2038 = vst.msk [vmem:[%s3590_s17 + $0x80] sm:$0xff] %vm691_vm1, %v1959_v17  ;;  %v1762_v60 = vsub.f32 %v3904_v45, %v1729_v37  ;;  %2854 = vlog2.f32 %v4012_v43 }
 0x499   : > { %v2837_v30 = vpop.eup %2836  ;;  %v1763_v22 = vsub.f32 %v3883_v19, %v1731_v8  ;;  %v4340_v19 = vunpack.i.l.bf16 %v3288_v25  ;;  %2856 = vlog2.f32 %v4014_v20 }
 0x49a   : > { %v2839_v28 = vpop.eup %2838  ;;  %v1725_v61 = vmul.f32 0.6931472, %v2837_v30  ;;  %v1965_v18 = vpop.permute.xlu1 %1964  ;;  %1798 = vrot.lane.b32.xlu1 %v1757_v53, %s2914_s29  ;;  %2858 = vlog2.f32 %v4016_v14 }
 0x49b   : > { %v1963_v7 = vpop.permute.xlu0 %1962  ;;  %2041 = vst.msk [vmem:[%s3590_s17 + $0x98] sm:$0xff] %vm691_vm1, %v1965_v18  ;;  %1808 = vrot.lane.b32.xlu0 %v1762_v60, %s2914_s29  ;;  %v1727_v62 = vmul.f32 0.6931472, %v2839_v28  ;;  %2860 = vlog2.f32 %v4018_v44 }
 0x49c   : > { %2040 = vst.msk [vmem:[%s3590_s17 + $0x90] sm:$0xff] %vm691_vm1, %v1963_v7  ;;  %v1760_v45 = vsub.f32 %v3913_v24, %v1725_v61  ;;  %v1892_v24 = vmul.f32 %v4340_v19, %v3531_v54  ;;  %2862 = vlog2.f32 %v4020_v1 }
 0x49d   : > { %v1761_v52 = vsub.f32 %v3896_v46, %v1727_v62  ;;  %v4341_v46 = vunpack.i.h.bf16 %v3288_v25  ;;  %v2841_v25 = vpop.eup %2840  ;;  %2864 = vlog2.f32 %v4022_v11 }
 0x49e   : > { %v1969_v59 = vpop.permute.xlu1 %1968  ;;  %1810 = vrot.lane.b32.xlu1 %v1763_v22, %s2914_s29  ;;  %v2843_v33 = vpop.eup %2842  ;;  %2866 = vlog2.f32 %v4024_v58  ;;  %v4343_v22 = vld [vmem:[#allocation7_spill] sm:$0xff] }
 0x49f   : > { %v1967_v40 = vpop.permute.xlu0 %1966  ;;  %2043 = vst.msk [vmem:[%s3590_s17 + $0xa8] sm:$0xff] %vm691_vm1, %v1969_v59  ;;  %1804 = vrot.lane.b32.xlu0 %v1760_v45, %s2914_s29  ;;  %v1893_v10 = vmul.f32 %v4341_v46, %v3540_v51  ;;  %v1673_v51 = vmul.f32 0.6931472, %v2841_v25  ;;  %v2845_v32 = vpop.eup %2844  ;;  %v1669_v34 = vmul.f32 0.6931472, %v2843_v33  ;;  %2868 = vlog2.f32 %v4026_v31  ;;  %v4342_v31 = vld [vmem:[#allocation11_spill] sm:$0xff] }
 0x4a0   : > { %2042 = vst.msk [vmem:[%s3590_s17 + $0xa0] sm:$0xff] %vm691_vm1, %v1967_v40  ;;  %v2847_v63 = vpop.eup %2846  ;;  %v1671_v12 = vmul.f32 0.6931472, %v2845_v32  ;;  %2870 = vlog2.f32 %v4028_v49 }
 0x4a1   : > { %v1734_v36 = vsub.f32 %v3655_v2, %v1673_v51  ;;  %v2849_v21 = vpop.eup %2848  ;;  %v1732_v2 = vsub.f32 %v3661_v4, %v1669_v34  ;;  %v1675_v20 = vmul.f32 0.6931472, %v2847_v63  ;;  %v4346_v51 = vld [vmem:[#allocation13_spill] sm:$0xff] }
 0x4a2   : > { %v1973_v29 = vpop.permute.xlu1 %1972  ;;  %1806 = vrot.lane.b32.xlu1 %v1761_v52, %s2914_s29  ;;  %v2851_v41 = vpop.eup %2850  ;;  %v1681_v47 = vmul.f32 0.6931472, %v2849_v21  ;;  %v1733_v6 = vsub.f32 %v3783_v35, %v1671_v12  ;;  %v4347_v34 = vld [vmem:[#allocation9_spill] sm:$0xff] }
 0x4a3   : > { %v1971_v15 = vpop.permute.xlu0 %1970  ;;  %2045 = vst.msk [vmem:[%s3590_s17 + $0xb8] sm:$0xff] %vm691_vm1, %v1973_v29  ;;  %1986 = vrot.lane.b32.xlu0 %v1892_v24, %s2913_s15  ;;  %v2853_v27 = vpop.eup %2852  ;;  %v1735_v14 = vsub.f32 %v3778_v50, %v1675_v20  ;;  %v1683_v44 = vmul.f32 0.6931472, %v2851_v41  ;;  %v4344_v24 = vld [vmem:[#allocation12_spill] sm:$0xff]  ;;  %v4348_v20 = vld [vmem:[#allocation14_spill] sm:$0xff] }
 0x4a4   : > { %2044 = vst.msk [vmem:[%s3590_s17 + $0xb0] sm:$0xff] %vm691_vm1, %v1971_v15  ;;  %v2855_v35 = vpop.eup %2854  ;;  %v1738_v5 = vsub.f32 %v3667_v3, %v1681_v47  ;;  %v1677_v38 = vmul.f32 0.6931472, %v2853_v27 }
 0x4a5   : > { %v2857_v57 = vpop.eup %2856  ;;  %v1739_v11 = vsub.f32 %v3787_v55, %v1683_v44  ;;  %v1679_v53 = vmul.f32 0.6931472, %v2855_v35 }
 0x4a6   : > { %v1977_v0 = vpop.permute.xlu1 %1976  ;;  %1988 = vrot.lane.b32.xlu1 %v1893_v10, %s2913_s15  ;;  %v2859_v3 = vpop.eup %2858  ;;  %v1736_v60 = vsub.f32 %v3671_v56, %v1677_v38  ;;  %v1689_v8 = vmul.f32 0.6931472, %v2857_v57  ;;  %v4345_v10 = vld [vmem:[#allocation8_spill] sm:$0xff]  ;;  %v2162_v57 = vld [vmem:[%s3590_s17] sm:$0xff] (%p2989_p10) }
 0x4a7   : > { %v1975_v54 = vpop.permute.xlu0 %1974  ;;  %2047 = vst.msk [vmem:[%s3590_s17 + $0xc8] sm:$0xff] %vm691_vm1, %v1977_v0  ;;  %v2861_v28 = vpop.eup %2860  ;;  %v1737_v18 = vsub.f32 %v4342_v31, %v1679_v53  ;;  %v1691_v7 = vmul.f32 0.6931472, %v2859_v3  ;;  %2163 = vst [vmem:[%s4199_s26] sm:$0xff] (%p2989_p10), %v2162_v57  ;;  %v2172_v53 = vld [vmem:[%s3590_s17 + $0x28] sm:$0xff] (%p2989_p10)  ;;  %v2174_v3 = vld [vmem:[%s3590_s17 + $0x30] sm:$0xff] (%p2989_p10) }
 0x4a8   : > { %2046 = vst.msk [vmem:[%s3590_s17 + $0xc0] sm:$0xff] %vm691_vm1, %v1975_v54  ;;  %v2863_v56 = vpop.eup %2862  ;;  %v1742_v45 = vsub.f32 %v4343_v22, %v1689_v8  ;;  %v1685_v62 = vmul.f32 0.6931472, %v2861_v28  ;;  %2173 = vst [vmem:[%s4199_s26 + $0x28] sm:$0xff] (%p2989_p10), %v2172_v53  ;;  %v2178_v8 = vld [vmem:[%s3590_s17 + $0x40] sm:$0xff] (%p2989_p10)  ;;  %v2182_v28 = vld [vmem:[%s3590_s17 + $0x50] sm:$0xff] (%p2989_p10) }
 0x4a9   : > { %v2865_v40 = vpop.eup %2864  ;;  %v1743_v29 = vsub.f32 %v4344_v24, %v1691_v7  ;;  %v1687_v15 = vmul.f32 0.6931472, %v2863_v56  ;;  %2175 = vst [vmem:[%s4199_s26 + $0x30] sm:$0xff] (%p2989_p10), %v2174_v3  ;;  %2179 = vst [vmem:[%s4199_s26 + $0x40] sm:$0xff] (%p2989_p10), %v2178_v8  ;;  %v2190_v31 = vld [vmem:[%s3590_s17 + $0x70] sm:$0xff] (%p2989_p10)  ;;  %v2194_v7 = vld [vmem:[%s3590_s17 + $0x80] sm:$0xff] (%p2989_p10) }
 0x4aa   : > { %v1981_v23 = vpop.permute.xlu1 %1980  ;;  %v2867_v46 = vpop.eup %2866  ;;  %v1740_v0 = vsub.f32 %v4345_v10, %v1685_v62  ;;  %v1697_v54 = vmul.f32 0.6931472, %v2865_v40  ;;  %2183 = vst [vmem:[%s4199_s26 + $0x50] sm:$0xff] (%p2989_p10), %v2182_v28  ;;  %2191 = vst [vmem:[%s4199_s26 + $0x70] sm:$0xff] (%p2989_p10), %v2190_v31  ;;  %v2196_v56 = vld [vmem:[%s3590_s17 + $0x88] sm:$0xff] (%p2989_p10)  ;;  %v2198_v22 = vld [vmem:[%s3590_s17 + $0x90] sm:$0xff] (%p2989_p10) }
 0x4ab   : > { %v1979_v48 = vpop.permute.xlu0 %1978  ;;  %2049 = vst.msk [vmem:[%s3590_s17 + $0xd8] sm:$0xff] %vm691_vm1, %v1981_v23  ;;  %v1741_v33 = vsub.f32 %v4346_v51, %v1687_v15  ;;  %v1699_v32 = vmul.f32 0.6931472, %v2867_v46  ;;  %2195 = vst [vmem:[%s4199_s26 + $0x100] sm:$0xff] (%p2989_p10), %v2194_v7  ;;  %v2202_v62 = vld [vmem:[%s3590_s17 + $0xa0] sm:$0xff] (%p2989_p10)  ;;  %v2206_v40 = vld [vmem:[%s3590_s17 + $0xb0] sm:$0xff] (%p2989_p10) }
 0x4ac   : > { %2048 = vst.msk [vmem:[%s3590_s17 + $0xd0] sm:$0xff] %vm691_vm1, %v1979_v48  ;;  %v2869_v48 = vpop.eup %2868  ;;  %v1746_v63 = vsub.f32 %v4347_v34, %v1697_v54  ;;  %2197 = vst [vmem:[%s4199_s26 + $0x108] sm:$0xff] (%p2989_p10), %v2196_v56 }
 0x4ad   : > { %v1693_v12 = vmul.f32 0.6931472, %v2869_v48  ;;  %v1747_v41 = vsub.f32 %v4348_v20, %v1699_v32  ;;  %2199 = vst [vmem:[%s4199_s26 + $0x110] sm:$0xff] (%p2989_p10), %v2198_v22  ;;  %2203 = vst [vmem:[%s4199_s26 + $0x120] sm:$0xff] (%p2989_p10), %v2202_v62 }
 0x4ae   : > { %v1985_v42 = vpop.permute.xlu1 %1984  ;;  %2207 = vst [vmem:[%s4199_s26 + $0x130] sm:$0xff] (%p2989_p10), %v2206_v40 }
 0x4af   : > { %v1983_v9 = vpop.permute.xlu0 %1982  ;;  %2051 = vst.msk [vmem:[%s3590_s17 + $0xe8] sm:$0xff] %vm691_vm1, %v1985_v42 }
 0x4b0   : > { %2050 = vst.msk [vmem:[%s3590_s17 + $0xe0] sm:$0xff] %vm691_vm1, %v1983_v9 }
 0x4b3   : > { %v2214_v24 = vld [vmem:[%s3590_s17 + $0xd0] sm:$0xff] (%p2989_p10) }
 0x4b4   : > { %2215 = vst [vmem:[%s4199_s26 + $0x150] sm:$0xff] (%p2989_p10), %v2214_v24 }
 0x4b6   : > { %v2220_v46 = vld [vmem:[%s3590_s17 + $0xe8] sm:$0xff] (%p2989_p10) }
 0x4b7   : > { %v2218_v15 = vld [vmem:[%s3590_s17 + $0xe0] sm:$0xff] (%p2989_p10)  ;;  %2221 = vst [vmem:[%s4199_s26 + $0x168] sm:$0xff] (%p2989_p10), %v2220_v46 }
 0x4b8   : > { %2219 = vst [vmem:[%s4199_s26 + $0x160] sm:$0xff] (%p2989_p10), %v2218_v15 }
 0x4f4   : > { %v1785_v16 = vpop.permute.xlu1 %1784 }
 0x4f5   : > { %v1831_v43 = vsel %vm1828_vm5, %v1734_v36, %v1785_v16  ;;  %v2871_v36 = vpop.eup %2870 }
 0x4f6   : > { %1848 = vst.msk [vmem:[%s4116_s21 + $0x10] sm:$0xff] %vm1845_vm6, %v1831_v43  ;;  %v1695_v47 = vmul.f32 0.6931472, %v2871_v36 }
 0x4f8   : > { %v1781_v13 = vpop.permute.xlu1 %1780 }
 0x4f9   : > { %v1829_v26 = vsel %vm1828_vm5, %v1732_v2, %v1781_v13  ;;  %v1783_v39 = vpop.permute.xlu0 %1782 }
 0x4fa   : > { %1846 = vst.msk [vmem:[%s4116_s21] sm:$0xff] %vm1845_vm6, %v1829_v26  ;;  %v1830_v4 = vsel %vm1828_vm5, %v1733_v6, %v1783_v39  ;;  %v4349_v6 = vld [vmem:[#allocation10_spill] sm:$0xff] }
 0x4fb   : > { %1847 = vst.msk [vmem:[%s4116_s21 + $0x8] sm:$0xff] %vm1845_vm6, %v1830_v4  ;;  %v1744_v13 = vsub.f32 %v4349_v6, %v1693_v12 }
 0x4fc   : > { %v1787_v37 = vpop.permute.xlu1 %1786 }
 0x4fd   : > { %v1832_v1 = vsel %vm1828_vm5, %v1735_v14, %v1787_v37  ;;  %v1793_v17 = vpop.permute.xlu0 %1792  ;;  %v4350_v14 = vld [vmem:[#allocation15_spill] sm:$0xff] }
 0x4fe   : > { %1849 = vst.msk [vmem:[%s4116_s21 + $0x18] sm:$0xff] %vm1845_vm6, %v1832_v1  ;;  %v1835_v50 = vsel %vm1828_vm5, %v1738_v5, %v1793_v17  ;;  %v1745_v44 = vsub.f32 %v4350_v14, %v1695_v47  ;;  %v2164_v1 = vld [vmem:[%s3590_s17 + $0x8] sm:$0xff] (%p2989_p10)  ;;  %v2166_v17 = vld [vmem:[%s3590_s17 + $0x10] sm:$0xff] (%p2989_p10) }
 0x4ff   : > { %1852 = vst.msk [vmem:[%s4116_s21 + $0x30] sm:$0xff] %vm1845_vm6, %v1835_v50  ;;  %2165 = vst [vmem:[%s4199_s26 + $0x8] sm:$0xff] (%p2989_p10), %v2164_v1  ;;  %v2168_v50 = vld [vmem:[%s3590_s17 + $0x18] sm:$0xff] (%p2989_p10) }
 0x500   : > { %v1795_v30 = vpop.permute.xlu1 %1794  ;;  %2167 = vst [vmem:[%s4199_s26 + $0x10] sm:$0xff] (%p2989_p10), %v2166_v17  ;;  %2169 = vst [vmem:[%s4199_s26 + $0x18] sm:$0xff] (%p2989_p10), %v2168_v50 }
 0x501   : > { %v1836_v58 = vsel %vm1828_vm5, %v1739_v11, %v1795_v30  ;;  %v1789_v61 = vpop.permute.xlu0 %1788  ;;  %v2170_v11 = vld [vmem:[%s3590_s17 + $0x20] sm:$0xff] (%p2989_p10)  ;;  %v2180_v30 = vld [vmem:[%s3590_s17 + $0x48] sm:$0xff] (%p2989_p10) }
 0x502   : > { %1853 = vst.msk [vmem:[%s4116_s21 + $0x38] sm:$0xff] %vm1845_vm6, %v1836_v58  ;;  %v1833_v55 = vsel %vm1828_vm5, %v1736_v60, %v1789_v61  ;;  %2171 = vst [vmem:[%s4199_s26 + $0x20] sm:$0xff] (%p2989_p10), %v2170_v11  ;;  %v2176_v60 = vld [vmem:[%s3590_s17 + $0x38] sm:$0xff] (%p2989_p10)  ;;  %v2186_v61 = vld [vmem:[%s3590_s17 + $0x60] sm:$0xff] (%p2989_p10) }
 0x503   : > { %1850 = vst.msk [vmem:[%s4116_s21 + $0x20] sm:$0xff] %vm1845_vm6, %v1833_v55  ;;  %2177 = vst [vmem:[%s4199_s26 + $0x38] sm:$0xff] (%p2989_p10), %v2176_v60  ;;  %v2184_v58 = vld [vmem:[%s3590_s17 + $0x58] sm:$0xff] (%p2989_p10)  ;;  %v2188_v55 = vld [vmem:[%s3590_s17 + $0x68] sm:$0xff] (%p2989_p10) }
 0x504   : > { %v1791_v59 = vpop.permute.xlu1 %1790  ;;  %2181 = vst [vmem:[%s4199_s26 + $0x48] sm:$0xff] (%p2989_p10), %v2180_v30  ;;  %2185 = vst [vmem:[%s4199_s26 + $0x58] sm:$0xff] (%p2989_p10), %v2184_v58 }
 0x505   : > { %v1834_v52 = vsel %vm1828_vm5, %v1737_v18, %v1791_v59  ;;  %v1801_v49 = vpop.permute.xlu0 %1800  ;;  %2187 = vst [vmem:[%s4199_s26 + $0x60] sm:$0xff] (%p2989_p10), %v2186_v61  ;;  %2189 = vst [vmem:[%s4199_s26 + $0x68] sm:$0xff] (%p2989_p10), %v2188_v55  ;;  %v2192_v18 = vld [vmem:[%s3590_s17 + $0x78] sm:$0xff] (%p2989_p10)  ;;  %v2204_v59 = vld [vmem:[%s3590_s17 + $0xa8] sm:$0xff] (%p2989_p10) }
 0x506   : > { %1851 = vst.msk [vmem:[%s4116_s21 + $0x28] sm:$0xff] %vm1845_vm6, %v1834_v52  ;;  %v1839_v19 = vsel %vm1828_vm5, %v1742_v45, %v1801_v49  ;;  %2193 = vst [vmem:[%s4199_s26 + $0x78] sm:$0xff] (%p2989_p10), %v2192_v18  ;;  %v2200_v45 = vld [vmem:[%s3590_s17 + $0x98] sm:$0xff] (%p2989_p10)  ;;  %v2210_v49 = vld [vmem:[%s3590_s17 + $0xc0] sm:$0xff] (%p2989_p10) }
 0x507   : > { %1856 = vst.msk [vmem:[%s4116_s21 + $0x50] sm:$0xff] %vm1845_vm6, %v1839_v19  ;;  %2201 = vst [vmem:[%s4199_s26 + $0x118] sm:$0xff] (%p2989_p10), %v2200_v45  ;;  %v2208_v52 = vld [vmem:[%s3590_s17 + $0xb8] sm:$0xff] (%p2989_p10)  ;;  %v2212_v19 = vld [vmem:[%s3590_s17 + $0xc8] sm:$0xff] (%p2989_p10) }
 0x508   : > { %v1803_v23 = vpop.permute.xlu1 %1802  ;;  %2205 = vst [vmem:[%s4199_s26 + $0x128] sm:$0xff] (%p2989_p10), %v2204_v59  ;;  %2209 = vst [vmem:[%s4199_s26 + $0x138] sm:$0xff] (%p2989_p10), %v2208_v52 }
 0x509   : > { %v1840_v42 = vsel %vm1828_vm5, %v1743_v29, %v1803_v23  ;;  %v1797_v9 = vpop.permute.xlu0 %1796  ;;  %2211 = vst [vmem:[%s4199_s26 + $0x140] sm:$0xff] (%p2989_p10), %v2210_v49  ;;  %2213 = vst [vmem:[%s4199_s26 + $0x148] sm:$0xff] (%p2989_p10), %v2212_v19  ;;  %v2216_v29 = vld [vmem:[%s3590_s17 + $0xd8] sm:$0xff] (%p2989_p10) }
 0x50a   : > { %1857 = vst.msk [vmem:[%s4116_s21 + $0x58] sm:$0xff] %vm1845_vm6, %v1840_v42  ;;  %v1837_v25 = vsel %vm1828_vm5, %v1740_v0, %v1797_v9  ;;  %2217 = vst [vmem:[%s4199_s26 + $0x158] sm:$0xff] (%p2989_p10), %v2216_v29 }
 0x50b   : > { %1854 = vst.msk [vmem:[%s4116_s21 + $0x40] sm:$0xff] %vm1845_vm6, %v1837_v25 }
 0x50c   : > { %v1799_v16 = vpop.permute.xlu1 %1798 }
 0x50d   : > { %v1838_v21 = vsel %vm1828_vm5, %v1741_v33, %v1799_v16  ;;  %v1809_v43 = vpop.permute.xlu0 %1808 }
 0x50e   : > { %1855 = vst.msk [vmem:[%s4116_s21 + $0x48] sm:$0xff] %vm1845_vm6, %v1838_v21  ;;  %v1843_v2 = vsel %vm1828_vm5, %v1746_v63, %v1809_v43 }
 0x50f   : > { %1860 = vst.msk [vmem:[%s4116_s21 + $0x70] sm:$0xff] %vm1845_vm6, %v1843_v2 }
 0x510   : > { %v1811_v27 = vpop.permute.xlu1 %1810 }
 0x511   : > { %v1844_v26 = vsel %vm1828_vm5, %v1747_v41, %v1811_v27  ;;  %v1805_v39 = vpop.permute.xlu0 %1804 }
 0x512   : > { %1861 = vst.msk [vmem:[%s4116_s21 + $0x78] sm:$0xff] %vm1845_vm6, %v1844_v26  ;;  %v1841_v4 = vsel %vm1828_vm5, %v1744_v13, %v1805_v39 }
 0x513   : > { %1858 = vst.msk [vmem:[%s4116_s21 + $0x60] sm:$0xff] %vm1845_vm6, %v1841_v4  ;;  %2069 = sbr.rel (!%p2989_p10) target bundleno = 1314 (0x522), region = 89 }
 0x514   : > { %v1807_v35 = vpop.permute.xlu1 %1806 }
 0x515   : > { %v1842_v5 = vsel %vm1828_vm5, %v1745_v44, %v1807_v35  ;;  %v1987_v38 = vpop.permute.xlu0 %1986 }
 0x516   : > { %1859 = vst.msk [vmem:[%s4116_s21 + $0x68] sm:$0xff] %vm1845_vm6, %v1842_v5 }
 0x517   : > { %2052 = vst.msk [vmem:[%s3590_s17 + $0xf0] sm:$0xff] %vm691_vm1, %v1987_v38 }
 0x518   : > { %v1989_v37 = vpop.permute.xlu1 %1988 }
 0x519   : > { %2053 = vst.msk [vmem:[%s3590_s17 + $0xf8] sm:$0xff] %vm691_vm1, %v1989_v37 }
 0x51e   : > { %v2222_v10 = vld [vmem:[%s3590_s17 + $0xf0] sm:$0xff] }
 0x51f   : > { %2223 = vst [vmem:[%s4199_s26 + $0x170] sm:$0xff] %v2222_v10 }
 0x520   : > { %v2224_v0 = vld [vmem:[%s3590_s17 + $0xf8] sm:$0xff] }
 0x521   : > { %2225 = vst [vmem:[%s4199_s26 + $0x178] sm:$0xff] %v2224_v0 }
 0x522 PF: > { %p21_p2 = scmp.ge.s32.totalorder %s2977_s9, 4   ;;  %s4351_s29 = smov %s2904_s30 }
 0x523   : > { %s4352_s30 = smov %s2987_s12  ;;  %s4353_s8 = smov %s2977_s9 }
 0x524   :  { %23 = sbr.rel (!%p21_p2) target bundleno = 17 (0x11), region = 166 }

</bundles_post_ra>
